<compile_context>
chip_gen: v6e
topology: v6e:2x2x1
jax: 0.10.0
libtpu: 0.0.40
codegen_flags: <defaults>
</compile_context>

<pallas_src>
import functools

import jax
import jax.numpy as jnp
from jax.experimental import pallas as pl
from jax.experimental.pallas import tpu as pltpu

USE_BF16 = False  # True on v6e/v7x for faster MXU passes; loosen allclose to ~1e-3.


# ----------------------------- Pallas kernel ------------------------------ #
def _lstm_kernel(x_ref, w_ref, b_ref, out_ref, *,
                 seq_len, batch, batch_pad, in_pad, hidden, mid2, n_out,
                 use_bf16):
    T, B, Bp, H, M2 = seq_len, batch, batch_pad, hidden, mid2
    G = 4 * H                                   # gate width (= slab lane width)
    cdt = jnp.bfloat16 if use_bf16 else jnp.float32

    # ---- carve the packed weight slab (static, 8-row-aligned slices) ------ #
    r = 0
    wih1 = w_ref[r:r + in_pad, :]; r += in_pad          # (in_pad, G) zero-padded rows
    whh1 = w_ref[r:r + H, :].astype(cdt); r += H        # (H, G)
    wih2 = w_ref[r:r + H, :].astype(cdt); r += H        # (H, G)
    whh2 = w_ref[r:r + H, :].astype(cdt); r += H        # (H, G)
    wfc1 = w_ref[r:r + H, :]; r += H                    # (H, G)  valid cols [:M2]
    wfc2 = w_ref[r:r + G, :]; r += G                    # (G, G)  valid [:M2, :n_out]

    # ---- biases (hoisted loads / broadcasts, loop-invariant) -------------- #
    b1 = b_ref[0:1, :]                                   # (1, G)
    b2 = jnp.broadcast_to(b_ref[1:2, :], (Bp, G))        # hoisted: used every step
    bfc1 = b_ref[2:3, :]                                 # (1, G) valid [:M2], rest 0
    bfc2 = b_ref[3:4, :]                                 # (1, G) valid [:n_out]

    # ---- Layer-1 input projection for ALL time steps in one MXU pass ------ #
    # x_ref is time-major flattened (T*Bp, in_pad); rows t*Bp:(t+1)*Bp = step t.
    xg1 = (jnp.dot(x_ref[...], wih1, preferred_element_type=jnp.float32)
           + b1)                                         # (T*Bp, G)

    def gate_acts(gates):
        # Two full-(Bp,G)-vreg EUP transcendentals; PyTorch layout [i, f, g, o].
        sig = jax.nn.sigmoid(gates)
        tnh = jnp.tanh(gates)
        return (sig[:, 0 * H:1 * H], sig[:, 1 * H:2 * H],
                tnh[:, 2 * H:3 * H], sig[:, 3 * H:4 * H])

    zeros = jnp.zeros((Bp, H), jnp.float32)
    h1, c1, h2, c2 = zeros, zeros, zeros, zeros

    # Fully unrolled time loop (T small & static).
    for t in range(T):
        # Layer-2 recurrent term depends only on h2(t-1): issue its MXU push
        # first so it overlaps with layer-1 compute of this step.
        g2_rec = jnp.dot(h2.astype(cdt), whh2, preferred_element_type=jnp.float32)

        # -------- layer 1: only the recurrent matmul remains per step ------ #
        g1 = xg1[t * Bp:(t + 1) * Bp, :] + jnp.dot(
            h1.astype(cdt), whh1, preferred_element_type=jnp.float32)
        i1, f1, gg1, o1 = gate_acts(g1)
        c1 = f1 * c1 + i1 * gg1
        h1 = o1 * jnp.tanh(c1)

        # -------- layer 2: no lane concat; h1-dependent matmul only -------- #
        g2 = (jnp.dot(h1.astype(cdt), wih2, preferred_element_type=jnp.float32)
              + g2_rec + b2)
        i2, f2, gg2, o2 = gate_acts(g2)
        c2 = f2 * c2 + i2 * gg2
        h2 = o2 * jnp.tanh(c2)

    # ---- FC head on final h2 (== lstm_out[:, -1, :]) ---------------------- #
    # wfc1/bfc1 are zero beyond col M2, so z[:, M2:] == 0 and the zero-padded
    # rows of wfc2 contribute nothing -> padded lanes stay exact zeros.
    z = jnp.dot(h2, wfc1, preferred_element_type=jnp.float32) + bfc1   # (Bp, G)
    z = jnp.where(z >= 0, z, 0.05 * z)                   # LeakyReLU(0.05)
    # TODO(synk): Dropout(0.2) is identity at inference time; no mask applied here.
    y = jnp.dot(z, wfc2, preferred_element_type=jnp.float32) + bfc2    # (Bp, G)
    out_ref[...] = jax.nn.sigmoid(y)[:B, :n_out]         # drop padded rows/lanes


# ------------------------------ JAX wrapper -------------------------------- #
def lstm_forward(x, p, *, use_bf16=USE_BF16):
    """x: (B, T, In) float32 (batch_first, PyTorch convention). Returns (B, Out)."""
    B, T, In = x.shape
    H = p["whh1"].shape[0]
    M2 = p["wfc1"].shape[1]
    Out = p["wfc2"].shape[1]
    G = 4 * H
    assert H % 8 == 0 and G % 128 == 0 and G >= M2 and G >= Out

    Bp = max(8, ((B + 7) // 8) * 8)          # sublane-pad batch to a full vreg
    In_pad = ((In + 7) // 8) * 8             # 8-align the contraction dim

    # Time-major, batch/feature zero-padded, flattened to (T*Bp, In_pad);
    # loaded into VMEM once (no per-step DMA).
    x_tm = jnp.transpose(x, (1, 0, 2))                              # (T, B, In)
    x_tm = jnp.pad(x_tm, ((0, 0), (0, Bp - B), (0, In_pad - In)))
    x_flat = x_tm.reshape(T * Bp, In_pad).astype(jnp.float32)

    # One lane-padded weight slab (all blocks 8-row-aligned), built once host-side.
    def padw(w, rows, cols=G):
        r, c = w.shape
        return jnp.pad(w.astype(jnp.float32), ((0, rows - r), (0, cols - c)))

    w_slab = jnp.concatenate([
        padw(p["wih1"], In_pad),     # rows [0,                In_pad)
        padw(p["whh1"], H),          # rows [In_pad,           In_pad+H)
        padw(p["wih2"], H),          # rows [In_pad+H,         In_pad+2H)
        padw(p["whh2"], H),          # rows [In_pad+2H,        In_pad+3H)
        padw(p["wfc1"], H),          # rows [In_pad+3H,        In_pad+4H)
        padw(p["wfc2"], G),          # rows [In_pad+4H,        In_pad+4H+G)
    ], axis=0)

    # One bias slab (8 rows x G lanes): b1, b2, bfc1, bfc2, zero filler.
    padb = lambda b: jnp.pad(b.reshape(1, -1).astype(jnp.float32),
                             ((0, 0), (0, G - b.size)))
    b_slab = jnp.concatenate(
        [padb(p["b1"]), padb(p["b2"]), padb(p["bfc1"]), padb(p["bfc2"]),
         jnp.zeros((4, G), jnp.float32)], axis=0)

    # Advisory cost estimate for XLA's scheduler around the custom call.
    flops = (2 * (T * Bp) * In_pad * G           # input projection (all steps)
             + T * 6 * Bp * H * G                # 3 recurrent matmuls / step
             + 2 * Bp * H * G + 2 * Bp * G * G)  # FC head
    transc = T * (4 * Bp * G + 2 * Bp * H) + Bp * G
    bytes_acc = 4 * (x_flat.size + w_slab.size + b_slab.size + B * Out)

    kernel = functools.partial(
        _lstm_kernel, seq_len=T, batch=B, batch_pad=Bp, in_pad=In_pad,
        hidden=H, mid2=M2, n_out=Out, use_bf16=use_bf16)

    vmem = lambda: pl.BlockSpec(memory_space=pltpu.MemorySpace.VMEM)
    return pl.pallas_call(
        kernel,
        out_shape=jax.ShapeDtypeStruct((B, Out), jnp.float32),
        in_specs=[vmem(), vmem(), vmem()],
        out_specs=vmem(),
        cost_estimate=pl.CostEstimate(flops=int(flops),
                                      transcendentals=int(transc),
                                      bytes_accessed=int(bytes_acc)),
    )(x_flat, w_slab, b_slab)


# --------------------------- Pure-JAX reference ---------------------------- #
def lstm_ref(x, p):
    B, T, In = x.shape
    H = p["whh1"].shape[0]

    def cell(x_in, h, c, wih, whh, b):
        g = x_in @ wih + h @ whh + b
        i = jax.nn.sigmoid(g[:, :H])
        f = jax.nn.sigmoid(g[:, H:2 * H])
        gg = jnp.tanh(g[:, 2 * H:3 * H])
        o = jax.nn.sigmoid(g[:, 3 * H:])
        c = f * c + i * gg
        h = o * jnp.tanh(c)
        return h, c

    def step(carry, x_t):
        h1, c1, h2, c2 = carry
        h1, c1 = cell(x_t, h1, c1, p["wih1"], p["whh1"], p["b1"])
        h2, c2 = cell(h1, h2, c2, p["wih2"], p["whh2"], p["b2"])
        return (h1, c1, h2, c2), None

    z0 = jnp.zeros((B, H), jnp.float32)
    (h1, c1, h2, c2), _ = jax.lax.scan(step, (z0, z0, z0, z0),
                                       jnp.transpose(x, (1, 0, 2)))
    z = h2 @ p["wfc1"] + p["bfc1"]
    z = jnp.where(z >= 0, z, 0.05 * z)
    return jax.nn.sigmoid(z @ p["wfc2"] + p["bfc2"])


# ----------------------------- Param init ---------------------------------- #
def init_params(key, n_in, n_out, h, m2):
    ks = jax.random.split(key, 12)
    k_lstm = 1.0 / jnp.sqrt(h)
    u = lambda k, shape, bound: jax.random.uniform(
        k, shape, jnp.float32, minval=-bound, maxval=bound)
    return {
        # layer-1 LSTM (weights stored transposed for x @ W)
        "wih1": u(ks[0], (n_in, 4 * h), k_lstm),
        "whh1": u(ks[1], (h, 4 * h), k_lstm),
        "b1":   u(ks[2], (1, 4 * h), k_lstm) + u(ks[3], (1, 4 * h), k_lstm),
        # layer-2 LSTM (input is h from layer 1)
        "wih2": u(ks[4], (h, 4 * h), k_lstm),
        "whh2": u(ks[5], (h, 4 * h), k_lstm),
        "b2":   u(ks[6], (1, 4 * h), k_lstm) + u(ks[7], (1, 4 * h), k_lstm),
        # fully-connected head
        "wfc1": u(ks[8], (h, m2), 1.0 / jnp.sqrt(h)),
        "bfc1": u(ks[9], (1, m2), 1.0 / jnp.sqrt(h)),
        "wfc2": u(ks[10], (m2, n_out), 1.0 / jnp.sqrt(m2)),
        "bfc2": u(ks[11], (1, n_out), 1.0 / jnp.sqrt(m2)),
    }


# --------------------------------- Main ------------------------------------ #
if __name__ == "__main__":
    B, T, IN, OUT, H, M2 = 2, 8, 4, 3, 32, 16

    key = jax.random.PRNGKey(0)
    kx, kp = jax.random.split(key)
    x = jax.random.normal(kx, (B, T, IN), dtype=jnp.float32)
    params = init_params(kp, IN, OUT, H, M2)

    out = jax.block_until_ready(lstm_forward(x, params))
    ref = jax.block_until_ready(lstm_ref(x, params))

    assert out.shape == (B, OUT), out.shape
    tol = 2e-3 if USE_BF16 else 1e-5
    assert jnp.allclose(out, ref, atol=tol, rtol=tol), (out, ref)
    print("KERNEL_OK")
</pallas_src>

<mosaic_0001>
module attributes {stable_mosaic.version = 11 : i64} {
  func.func @_lstm_kernel(%arg0: memref<64x8xf32, #tpu.memory_space<vmem>>, %arg1: memref<264x128xf32, #tpu.memory_space<vmem>>, %arg2: memref<8x128xf32, #tpu.memory_space<vmem>>, %arg3: memref<2x3xf32, #tpu.memory_space<vmem>>) attributes {dimension_semantics = [], scalar_prefetch = 0 : i64, scratch_operands = 0 : i64, tpu.core_type = #tpu.core_type<tc>} {
    %c0 = arith.constant 0 : index
    %c0_0 = arith.constant 0 : index
    %0 = vector.load %arg1[%c0, %c0_0] : memref<264x128xf32, #tpu.memory_space<vmem>>, vector<8x128xf32>
    %c8 = arith.constant 8 : index
    %c0_1 = arith.constant 0 : index
    %1 = vector.load %arg1[%c8, %c0_1] : memref<264x128xf32, #tpu.memory_space<vmem>>, vector<32x128xf32>
    %c40 = arith.constant 40 : index
    %c0_2 = arith.constant 0 : index
    %2 = vector.load %arg1[%c40, %c0_2] : memref<264x128xf32, #tpu.memory_space<vmem>>, vector<32x128xf32>
    %c72 = arith.constant 72 : index
    %c0_3 = arith.constant 0 : index
    %3 = vector.load %arg1[%c72, %c0_3] : memref<264x128xf32, #tpu.memory_space<vmem>>, vector<32x128xf32>
    %c104 = arith.constant 104 : index
    %c0_4 = arith.constant 0 : index
    %4 = vector.load %arg1[%c104, %c0_4] : memref<264x128xf32, #tpu.memory_space<vmem>>, vector<32x128xf32>
    %c136 = arith.constant 136 : index
    %c0_5 = arith.constant 0 : index
    %5 = vector.load %arg1[%c136, %c0_5] : memref<264x128xf32, #tpu.memory_space<vmem>>, vector<128x128xf32>
    %c0_6 = arith.constant 0 : index
    %c0_7 = arith.constant 0 : index
    %6 = vector.load %arg2[%c0_6, %c0_7] : memref<8x128xf32, #tpu.memory_space<vmem>>, vector<1x128xf32>
    %c1 = arith.constant 1 : index
    %c0_8 = arith.constant 0 : index
    %7 = vector.load %arg2[%c1, %c0_8] : memref<8x128xf32, #tpu.memory_space<vmem>>, vector<1x128xf32>
    %8 = vector.shape_cast %7 : vector<1x128xf32> to vector<1x128xf32>
    %9 = vector.broadcast %8 : vector<1x128xf32> to vector<8x128xf32>
    %c2 = arith.constant 2 : index
    %c0_9 = arith.constant 0 : index
    %10 = vector.load %arg2[%c2, %c0_9] : memref<8x128xf32, #tpu.memory_space<vmem>>, vector<1x128xf32>
    %c3 = arith.constant 3 : index
    %c0_10 = arith.constant 0 : index
    %11 = vector.load %arg2[%c3, %c0_10] : memref<8x128xf32, #tpu.memory_space<vmem>>, vector<1x128xf32>
    %c0_11 = arith.constant 0 : index
    %c0_12 = arith.constant 0 : index
    %12 = vector.load %arg0[%c0_11, %c0_12] : memref<64x8xf32, #tpu.memory_space<vmem>>, vector<64x8xf32>
    %cst = arith.constant dense<0.000000e+00> : vector<64x128xf32>
    %13 = tpu.matmul %12, %0, %cst {dimension_numbers = #tpu.dot_dimension_numbers<[1], [0], [0], [1], [0, 0, 1, 1], [], []>} : vector<64x8xf32>, vector<8x128xf32>, vector<64x128xf32> -> vector<64x128xf32>
    %14 = vector.broadcast %6 : vector<1x128xf32> to vector<64x128xf32>
    %15 = arith.addf %13, %14 : vector<64x128xf32>
    %cst_13 = arith.constant 0.000000e+00 : f32
    %16 = vector.broadcast %cst_13 : f32 to vector<8x32xf32>
    %cst_14 = arith.constant dense<0.000000e+00> : vector<8x128xf32>
    %17 = tpu.matmul %16, %3, %cst_14 {dimension_numbers = #tpu.dot_dimension_numbers<[1], [0], [0], [1], [0, 0, 1, 1], [], []>} : vector<8x32xf32>, vector<32x128xf32>, vector<8x128xf32> -> vector<8x128xf32>
    %18 = vector.extract_strided_slice %15 {offsets = [0, 0], sizes = [8, 128], strides = [1, 1]} : vector<64x128xf32> to vector<8x128xf32>
    %cst_15 = arith.constant dense<0.000000e+00> : vector<8x128xf32>
    %19 = tpu.matmul %16, %1, %cst_15 {dimension_numbers = #tpu.dot_dimension_numbers<[1], [0], [0], [1], [0, 0, 1, 1], [], []>} : vector<8x32xf32>, vector<32x128xf32>, vector<8x128xf32> -> vector<8x128xf32>
    %20 = arith.addf %18, %19 : vector<8x128xf32>
    %21 = arith.negf %20 : vector<8x128xf32>
    %22 = math.exp %21 : vector<8x128xf32>
    %cst_16 = arith.constant 1.000000e+00 : f32
    %23 = vector.broadcast %cst_16 : f32 to vector<8x128xf32>
    %24 = arith.addf %23, %22 : vector<8x128xf32>
    %25 = arith.divf %23, %24 : vector<8x128xf32>
    %26 = math.tanh %20 : vector<8x128xf32>
    %27 = vector.extract_strided_slice %25 {offsets = [0, 0], sizes = [8, 32], strides = [1, 1]} : vector<8x128xf32> to vector<8x32xf32>
    %28 = vector.extract_strided_slice %25 {offsets = [0, 32], sizes = [8, 32], strides = [1, 1]} : vector<8x128xf32> to vector<8x32xf32>
    %29 = vector.extract_strided_slice %26 {offsets = [0, 64], sizes = [8, 32], strides = [1, 1]} : vector<8x128xf32> to vector<8x32xf32>
    %30 = vector.extract_strided_slice %25 {offsets = [0, 96], sizes = [8, 32], strides = [1, 1]} : vector<8x128xf32> to vector<8x32xf32>
    %31 = arith.mulf %28, %16 : vector<8x32xf32>
    %32 = arith.mulf %27, %29 : vector<8x32xf32>
    %33 = arith.addf %31, %32 : vector<8x32xf32>
    %34 = math.tanh %33 : vector<8x32xf32>
    %35 = arith.mulf %30, %34 : vector<8x32xf32>
    %cst_17 = arith.constant dense<0.000000e+00> : vector<8x128xf32>
    %36 = tpu.matmul %35, %2, %cst_17 {dimension_numbers = #tpu.dot_dimension_numbers<[1], [0], [0], [1], [0, 0, 1, 1], [], []>} : vector<8x32xf32>, vector<32x128xf32>, vector<8x128xf32> -> vector<8x128xf32>
    %37 = arith.addf %36, %17 : vector<8x128xf32>
    %38 = arith.addf %37, %9 : vector<8x128xf32>
    %39 = arith.negf %38 : vector<8x128xf32>
    %40 = math.exp %39 : vector<8x128xf32>
    %cst_18 = arith.constant 1.000000e+00 : f32
    %41 = vector.broadcast %cst_18 : f32 to vector<8x128xf32>
    %42 = arith.addf %41, %40 : vector<8x128xf32>
    %43 = arith.divf %41, %42 : vector<8x128xf32>
    %44 = math.tanh %38 : vector<8x128xf32>
    %45 = vector.extract_strided_slice %43 {offsets = [0, 0], sizes = [8, 32], strides = [1, 1]} : vector<8x128xf32> to vector<8x32xf32>
    %46 = vector.extract_strided_slice %43 {offsets = [0, 32], sizes = [8, 32], strides = [1, 1]} : vector<8x128xf32> to vector<8x32xf32>
    %47 = vector.extract_strided_slice %44 {offsets = [0, 64], sizes = [8, 32], strides = [1, 1]} : vector<8x128xf32> to vector<8x32xf32>
    %48 = vector.extract_strided_slice %43 {offsets = [0, 96], sizes = [8, 32], strides = [1, 1]} : vector<8x128xf32> to vector<8x32xf32>
    %49 = arith.mulf %46, %16 : vector<8x32xf32>
    %50 = arith.mulf %45, %47 : vector<8x32xf32>
    %51 = arith.addf %49, %50 : vector<8x32xf32>
    %52 = math.tanh %51 : vector<8x32xf32>
    %53 = arith.mulf %48, %52 : vector<8x32xf32>
    %cst_19 = arith.constant dense<0.000000e+00> : vector<8x128xf32>
    %54 = tpu.matmul %53, %3, %cst_19 {dimension_numbers = #tpu.dot_dimension_numbers<[1], [0], [0], [1], [0, 0, 1, 1], [], []>} : vector<8x32xf32>, vector<32x128xf32>, vector<8x128xf32> -> vector<8x128xf32>
    %55 = vector.extract_strided_slice %15 {offsets = [8, 0], sizes = [8, 128], strides = [1, 1]} : vector<64x128xf32> to vector<8x128xf32>
    %cst_20 = arith.constant dense<0.000000e+00> : vector<8x128xf32>
    %56 = tpu.matmul %35, %1, %cst_20 {dimension_numbers = #tpu.dot_dimension_numbers<[1], [0], [0], [1], [0, 0, 1, 1], [], []>} : vector<8x32xf32>, vector<32x128xf32>, vector<8x128xf32> -> vector<8x128xf32>
    %57 = arith.addf %55, %56 : vector<8x128xf32>
    %58 = arith.negf %57 : vector<8x128xf32>
    %59 = math.exp %58 : vector<8x128xf32>
    %cst_21 = arith.constant 1.000000e+00 : f32
    %60 = vector.broadcast %cst_21 : f32 to vector<8x128xf32>
    %61 = arith.addf %60, %59 : vector<8x128xf32>
    %62 = arith.divf %60, %61 : vector<8x128xf32>
    %63 = math.tanh %57 : vector<8x128xf32>
    %64 = vector.extract_strided_slice %62 {offsets = [0, 0], sizes = [8, 32], strides = [1, 1]} : vector<8x128xf32> to vector<8x32xf32>
    %65 = vector.extract_strided_slice %62 {offsets = [0, 32], sizes = [8, 32], strides = [1, 1]} : vector<8x128xf32> to vector<8x32xf32>
    %66 = vector.extract_strided_slice %63 {offsets = [0, 64], sizes = [8, 32], strides = [1, 1]} : vector<8x128xf32> to vector<8x32xf32>
    %67 = vector.extract_strided_slice %62 {offsets = [0, 96], sizes = [8, 32], strides = [1, 1]} : vector<8x128xf32> to vector<8x32xf32>
    %68 = arith.mulf %65, %33 : vector<8x32xf32>
    %69 = arith.mulf %64, %66 : vector<8x32xf32>
    %70 = arith.addf %68, %69 : vector<8x32xf32>
    %71 = math.tanh %70 : vector<8x32xf32>
    %72 = arith.mulf %67, %71 : vector<8x32xf32>
    %cst_22 = arith.constant dense<0.000000e+00> : vector<8x128xf32>
    %73 = tpu.matmul %72, %2, %cst_22 {dimension_numbers = #tpu.dot_dimension_numbers<[1], [0], [0], [1], [0, 0, 1, 1], [], []>} : vector<8x32xf32>, vector<32x128xf32>, vector<8x128xf32> -> vector<8x128xf32>
    %74 = arith.addf %73, %54 : vector<8x128xf32>
    %75 = arith.addf %74, %9 : vector<8x128xf32>
    %76 = arith.negf %75 : vector<8x128xf32>
    %77 = math.exp %76 : vector<8x128xf32>
    %cst_23 = arith.constant 1.000000e+00 : f32
    %78 = vector.broadcast %cst_23 : f32 to vector<8x128xf32>
    %79 = arith.addf %78, %77 : vector<8x128xf32>
    %80 = arith.divf %78, %79 : vector<8x128xf32>
    %81 = math.tanh %75 : vector<8x128xf32>
    %82 = vector.extract_strided_slice %80 {offsets = [0, 0], sizes = [8, 32], strides = [1, 1]} : vector<8x128xf32> to vector<8x32xf32>
    %83 = vector.extract_strided_slice %80 {offsets = [0, 32], sizes = [8, 32], strides = [1, 1]} : vector<8x128xf32> to vector<8x32xf32>
    %84 = vector.extract_strided_slice %81 {offsets = [0, 64], sizes = [8, 32], strides = [1, 1]} : vector<8x128xf32> to vector<8x32xf32>
    %85 = vector.extract_strided_slice %80 {offsets = [0, 96], sizes = [8, 32], strides = [1, 1]} : vector<8x128xf32> to vector<8x32xf32>
    %86 = arith.mulf %83, %51 : vector<8x32xf32>
    %87 = arith.mulf %82, %84 : vector<8x32xf32>
    %88 = arith.addf %86, %87 : vector<8x32xf32>
    %89 = math.tanh %88 : vector<8x32xf32>
    %90 = arith.mulf %85, %89 : vector<8x32xf32>
    %cst_24 = arith.constant dense<0.000000e+00> : vector<8x128xf32>
    %91 = tpu.matmul %90, %3, %cst_24 {dimension_numbers = #tpu.dot_dimension_numbers<[1], [0], [0], [1], [0, 0, 1, 1], [], []>} : vector<8x32xf32>, vector<32x128xf32>, vector<8x128xf32> -> vector<8x128xf32>
    %92 = vector.extract_strided_slice %15 {offsets = [16, 0], sizes = [8, 128], strides = [1, 1]} : vector<64x128xf32> to vector<8x128xf32>
    %cst_25 = arith.constant dense<0.000000e+00> : vector<8x128xf32>
    %93 = tpu.matmul %72, %1, %cst_25 {dimension_numbers = #tpu.dot_dimension_numbers<[1], [0], [0], [1], [0, 0, 1, 1], [], []>} : vector<8x32xf32>, vector<32x128xf32>, vector<8x128xf32> -> vector<8x128xf32>
    %94 = arith.addf %92, %93 : vector<8x128xf32>
    %95 = arith.negf %94 : vector<8x128xf32>
    %96 = math.exp %95 : vector<8x128xf32>
    %cst_26 = arith.constant 1.000000e+00 : f32
    %97 = vector.broadcast %cst_26 : f32 to vector<8x128xf32>
    %98 = arith.addf %97, %96 : vector<8x128xf32>
    %99 = arith.divf %97, %98 : vector<8x128xf32>
    %100 = math.tanh %94 : vector<8x128xf32>
    %101 = vector.extract_strided_slice %99 {offsets = [0, 0], sizes = [8, 32], strides = [1, 1]} : vector<8x128xf32> to vector<8x32xf32>
    %102 = vector.extract_strided_slice %99 {offsets = [0, 32], sizes = [8, 32], strides = [1, 1]} : vector<8x128xf32> to vector<8x32xf32>
    %103 = vector.extract_strided_slice %100 {offsets = [0, 64], sizes = [8, 32], strides = [1, 1]} : vector<8x128xf32> to vector<8x32xf32>
    %104 = vector.extract_strided_slice %99 {offsets = [0, 96], sizes = [8, 32], strides = [1, 1]} : vector<8x128xf32> to vector<8x32xf32>
    %105 = arith.mulf %102, %70 : vector<8x32xf32>
    %106 = arith.mulf %101, %103 : vector<8x32xf32>
    %107 = arith.addf %105, %106 : vector<8x32xf32>
    %108 = math.tanh %107 : vector<8x32xf32>
    %109 = arith.mulf %104, %108 : vector<8x32xf32>
    %cst_27 = arith.constant dense<0.000000e+00> : vector<8x128xf32>
    %110 = tpu.matmul %109, %2, %cst_27 {dimension_numbers = #tpu.dot_dimension_numbers<[1], [0], [0], [1], [0, 0, 1, 1], [], []>} : vector<8x32xf32>, vector<32x128xf32>, vector<8x128xf32> -> vector<8x128xf32>
    %111 = arith.addf %110, %91 : vector<8x128xf32>
    %112 = arith.addf %111, %9 : vector<8x128xf32>
    %113 = arith.negf %112 : vector<8x128xf32>
    %114 = math.exp %113 : vector<8x128xf32>
    %cst_28 = arith.constant 1.000000e+00 : f32
    %115 = vector.broadcast %cst_28 : f32 to vector<8x128xf32>
    %116 = arith.addf %115, %114 : vector<8x128xf32>
    %117 = arith.divf %115, %116 : vector<8x128xf32>
    %118 = math.tanh %112 : vector<8x128xf32>
    %119 = vector.extract_strided_slice %117 {offsets = [0, 0], sizes = [8, 32], strides = [1, 1]} : vector<8x128xf32> to vector<8x32xf32>
    %120 = vector.extract_strided_slice %117 {offsets = [0, 32], sizes = [8, 32], strides = [1, 1]} : vector<8x128xf32> to vector<8x32xf32>
    %121 = vector.extract_strided_slice %118 {offsets = [0, 64], sizes = [8, 32], strides = [1, 1]} : vector<8x128xf32> to vector<8x32xf32>
    %122 = vector.extract_strided_slice %117 {offsets = [0, 96], sizes = [8, 32], strides = [1, 1]} : vector<8x128xf32> to vector<8x32xf32>
    %123 = arith.mulf %120, %88 : vector<8x32xf32>
    %124 = arith.mulf %119, %121 : vector<8x32xf32>
    %125 = arith.addf %123, %124 : vector<8x32xf32>
    %126 = math.tanh %125 : vector<8x32xf32>
    %127 = arith.mulf %122, %126 : vector<8x32xf32>
    %cst_29 = arith.constant dense<0.000000e+00> : vector<8x128xf32>
    %128 = tpu.matmul %127, %3, %cst_29 {dimension_numbers = #tpu.dot_dimension_numbers<[1], [0], [0], [1], [0, 0, 1, 1], [], []>} : vector<8x32xf32>, vector<32x128xf32>, vector<8x128xf32> -> vector<8x128xf32>
    %129 = vector.extract_strided_slice %15 {offsets = [24, 0], sizes = [8, 128], strides = [1, 1]} : vector<64x128xf32> to vector<8x128xf32>
    %cst_30 = arith.constant dense<0.000000e+00> : vector<8x128xf32>
    %130 = tpu.matmul %109, %1, %cst_30 {dimension_numbers = #tpu.dot_dimension_numbers<[1], [0], [0], [1], [0, 0, 1, 1], [], []>} : vector<8x32xf32>, vector<32x128xf32>, vector<8x128xf32> -> vector<8x128xf32>
    %131 = arith.addf %129, %130 : vector<8x128xf32>
    %132 = arith.negf %131 : vector<8x128xf32>
    %133 = math.exp %132 : vector<8x128xf32>
    %cst_31 = arith.constant 1.000000e+00 : f32
    %134 = vector.broadcast %cst_31 : f32 to vector<8x128xf32>
    %135 = arith.addf %134, %133 : vector<8x128xf32>
    %136 = arith.divf %134, %135 : vector<8x128xf32>
    %137 = math.tanh %131 : vector<8x128xf32>
    %138 = vector.extract_strided_slice %136 {offsets = [0, 0], sizes = [8, 32], strides = [1, 1]} : vector<8x128xf32> to vector<8x32xf32>
    %139 = vector.extract_strided_slice %136 {offsets = [0, 32], sizes = [8, 32], strides = [1, 1]} : vector<8x128xf32> to vector<8x32xf32>
    %140 = vector.extract_strided_slice %137 {offsets = [0, 64], sizes = [8, 32], strides = [1, 1]} : vector<8x128xf32> to vector<8x32xf32>
    %141 = vector.extract_strided_slice %136 {offsets = [0, 96], sizes = [8, 32], strides = [1, 1]} : vector<8x128xf32> to vector<8x32xf32>
    %142 = arith.mulf %139, %107 : vector<8x32xf32>
    %143 = arith.mulf %138, %140 : vector<8x32xf32>
    %144 = arith.addf %142, %143 : vector<8x32xf32>
    %145 = math.tanh %144 : vector<8x32xf32>
    %146 = arith.mulf %141, %145 : vector<8x32xf32>
    %cst_32 = arith.constant dense<0.000000e+00> : vector<8x128xf32>
    %147 = tpu.matmul %146, %2, %cst_32 {dimension_numbers = #tpu.dot_dimension_numbers<[1], [0], [0], [1], [0, 0, 1, 1], [], []>} : vector<8x32xf32>, vector<32x128xf32>, vector<8x128xf32> -> vector<8x128xf32>
    %148 = arith.addf %147, %128 : vector<8x128xf32>
    %149 = arith.addf %148, %9 : vector<8x128xf32>
    %150 = arith.negf %149 : vector<8x128xf32>
    %151 = math.exp %150 : vector<8x128xf32>
    %cst_33 = arith.constant 1.000000e+00 : f32
    %152 = vector.broadcast %cst_33 : f32 to vector<8x128xf32>
    %153 = arith.addf %152, %151 : vector<8x128xf32>
    %154 = arith.divf %152, %153 : vector<8x128xf32>
    %155 = math.tanh %149 : vector<8x128xf32>
    %156 = vector.extract_strided_slice %154 {offsets = [0, 0], sizes = [8, 32], strides = [1, 1]} : vector<8x128xf32> to vector<8x32xf32>
    %157 = vector.extract_strided_slice %154 {offsets = [0, 32], sizes = [8, 32], strides = [1, 1]} : vector<8x128xf32> to vector<8x32xf32>
    %158 = vector.extract_strided_slice %155 {offsets = [0, 64], sizes = [8, 32], strides = [1, 1]} : vector<8x128xf32> to vector<8x32xf32>
    %159 = vector.extract_strided_slice %154 {offsets = [0, 96], sizes = [8, 32], strides = [1, 1]} : vector<8x128xf32> to vector<8x32xf32>
    %160 = arith.mulf %157, %125 : vector<8x32xf32>
    %161 = arith.mulf %156, %158 : vector<8x32xf32>
    %162 = arith.addf %160, %161 : vector<8x32xf32>
    %163 = math.tanh %162 : vector<8x32xf32>
    %164 = arith.mulf %159, %163 : vector<8x32xf32>
    %cst_34 = arith.constant dense<0.000000e+00> : vector<8x128xf32>
    %165 = tpu.matmul %164, %3, %cst_34 {dimension_numbers = #tpu.dot_dimension_numbers<[1], [0], [0], [1], [0, 0, 1, 1], [], []>} : vector<8x32xf32>, vector<32x128xf32>, vector<8x128xf32> -> vector<8x128xf32>
    %166 = vector.extract_strided_slice %15 {offsets = [32, 0], sizes = [8, 128], strides = [1, 1]} : vector<64x128xf32> to vector<8x128xf32>
    %cst_35 = arith.constant dense<0.000000e+00> : vector<8x128xf32>
    %167 = tpu.matmul %146, %1, %cst_35 {dimension_numbers = #tpu.dot_dimension_numbers<[1], [0], [0], [1], [0, 0, 1, 1], [], []>} : vector<8x32xf32>, vector<32x128xf32>, vector<8x128xf32> -> vector<8x128xf32>
    %168 = arith.addf %166, %167 : vector<8x128xf32>
    %169 = arith.negf %168 : vector<8x128xf32>
    %170 = math.exp %169 : vector<8x128xf32>
    %cst_36 = arith.constant 1.000000e+00 : f32
    %171 = vector.broadcast %cst_36 : f32 to vector<8x128xf32>
    %172 = arith.addf %171, %170 : vector<8x128xf32>
    %173 = arith.divf %171, %172 : vector<8x128xf32>
    %174 = math.tanh %168 : vector<8x128xf32>
    %175 = vector.extract_strided_slice %173 {offsets = [0, 0], sizes = [8, 32], strides = [1, 1]} : vector<8x128xf32> to vector<8x32xf32>
    %176 = vector.extract_strided_slice %173 {offsets = [0, 32], sizes = [8, 32], strides = [1, 1]} : vector<8x128xf32> to vector<8x32xf32>
    %177 = vector.extract_strided_slice %174 {offsets = [0, 64], sizes = [8, 32], strides = [1, 1]} : vector<8x128xf32> to vector<8x32xf32>
    %178 = vector.extract_strided_slice %173 {offsets = [0, 96], sizes = [8, 32], strides = [1, 1]} : vector<8x128xf32> to vector<8x32xf32>
    %179 = arith.mulf %176, %144 : vector<8x32xf32>
    %180 = arith.mulf %175, %177 : vector<8x32xf32>
    %181 = arith.addf %179, %180 : vector<8x32xf32>
    %182 = math.tanh %181 : vector<8x32xf32>
    %183 = arith.mulf %178, %182 : vector<8x32xf32>
    %cst_37 = arith.constant dense<0.000000e+00> : vector<8x128xf32>
    %184 = tpu.matmul %183, %2, %cst_37 {dimension_numbers = #tpu.dot_dimension_numbers<[1], [0], [0], [1], [0, 0, 1, 1], [], []>} : vector<8x32xf32>, vector<32x128xf32>, vector<8x128xf32> -> vector<8x128xf32>
    %185 = arith.addf %184, %165 : vector<8x128xf32>
    %186 = arith.addf %185, %9 : vector<8x128xf32>
    %187 = arith.negf %186 : vector<8x128xf32>
    %188 = math.exp %187 : vector<8x128xf32>
    %cst_38 = arith.constant 1.000000e+00 : f32
    %189 = vector.broadcast %cst_38 : f32 to vector<8x128xf32>
    %190 = arith.addf %189, %188 : vector<8x128xf32>
    %191 = arith.divf %189, %190 : vector<8x128xf32>
    %192 = math.tanh %186 : vector<8x128xf32>
    %193 = vector.extract_strided_slice %191 {offsets = [0, 0], sizes = [8, 32], strides = [1, 1]} : vector<8x128xf32> to vector<8x32xf32>
    %194 = vector.extract_strided_slice %191 {offsets = [0, 32], sizes = [8, 32], strides = [1, 1]} : vector<8x128xf32> to vector<8x32xf32>
    %195 = vector.extract_strided_slice %192 {offsets = [0, 64], sizes = [8, 32], strides = [1, 1]} : vector<8x128xf32> to vector<8x32xf32>
    %196 = vector.extract_strided_slice %191 {offsets = [0, 96], sizes = [8, 32], strides = [1, 1]} : vector<8x128xf32> to vector<8x32xf32>
    %197 = arith.mulf %194, %162 : vector<8x32xf32>
    %198 = arith.mulf %193, %195 : vector<8x32xf32>
    %199 = arith.addf %197, %198 : vector<8x32xf32>
    %200 = math.tanh %199 : vector<8x32xf32>
    %201 = arith.mulf %196, %200 : vector<8x32xf32>
    %cst_39 = arith.constant dense<0.000000e+00> : vector<8x128xf32>
    %202 = tpu.matmul %201, %3, %cst_39 {dimension_numbers = #tpu.dot_dimension_numbers<[1], [0], [0], [1], [0, 0, 1, 1], [], []>} : vector<8x32xf32>, vector<32x128xf32>, vector<8x128xf32> -> vector<8x128xf32>
    %203 = vector.extract_strided_slice %15 {offsets = [40, 0], sizes = [8, 128], strides = [1, 1]} : vector<64x128xf32> to vector<8x128xf32>
    %cst_40 = arith.constant dense<0.000000e+00> : vector<8x128xf32>
    %204 = tpu.matmul %183, %1, %cst_40 {dimension_numbers = #tpu.dot_dimension_numbers<[1], [0], [0], [1], [0, 0, 1, 1], [], []>} : vector<8x32xf32>, vector<32x128xf32>, vector<8x128xf32> -> vector<8x128xf32>
    %205 = arith.addf %203, %204 : vector<8x128xf32>
    %206 = arith.negf %205 : vector<8x128xf32>
    %207 = math.exp %206 : vector<8x128xf32>
    %cst_41 = arith.constant 1.000000e+00 : f32
    %208 = vector.broadcast %cst_41 : f32 to vector<8x128xf32>
    %209 = arith.addf %208, %207 : vector<8x128xf32>
    %210 = arith.divf %208, %209 : vector<8x128xf32>
    %211 = math.tanh %205 : vector<8x128xf32>
    %212 = vector.extract_strided_slice %210 {offsets = [0, 0], sizes = [8, 32], strides = [1, 1]} : vector<8x128xf32> to vector<8x32xf32>
    %213 = vector.extract_strided_slice %210 {offsets = [0, 32], sizes = [8, 32], strides = [1, 1]} : vector<8x128xf32> to vector<8x32xf32>
    %214 = vector.extract_strided_slice %211 {offsets = [0, 64], sizes = [8, 32], strides = [1, 1]} : vector<8x128xf32> to vector<8x32xf32>
    %215 = vector.extract_strided_slice %210 {offsets = [0, 96], sizes = [8, 32], strides = [1, 1]} : vector<8x128xf32> to vector<8x32xf32>
    %216 = arith.mulf %213, %181 : vector<8x32xf32>
    %217 = arith.mulf %212, %214 : vector<8x32xf32>
    %218 = arith.addf %216, %217 : vector<8x32xf32>
    %219 = math.tanh %218 : vector<8x32xf32>
    %220 = arith.mulf %215, %219 : vector<8x32xf32>
    %cst_42 = arith.constant dense<0.000000e+00> : vector<8x128xf32>
    %221 = tpu.matmul %220, %2, %cst_42 {dimension_numbers = #tpu.dot_dimension_numbers<[1], [0], [0], [1], [0, 0, 1, 1], [], []>} : vector<8x32xf32>, vector<32x128xf32>, vector<8x128xf32> -> vector<8x128xf32>
    %222 = arith.addf %221, %202 : vector<8x128xf32>
    %223 = arith.addf %222, %9 : vector<8x128xf32>
    %224 = arith.negf %223 : vector<8x128xf32>
    %225 = math.exp %224 : vector<8x128xf32>
    %cst_43 = arith.constant 1.000000e+00 : f32
    %226 = vector.broadcast %cst_43 : f32 to vector<8x128xf32>
    %227 = arith.addf %226, %225 : vector<8x128xf32>
    %228 = arith.divf %226, %227 : vector<8x128xf32>
    %229 = math.tanh %223 : vector<8x128xf32>
    %230 = vector.extract_strided_slice %228 {offsets = [0, 0], sizes = [8, 32], strides = [1, 1]} : vector<8x128xf32> to vector<8x32xf32>
    %231 = vector.extract_strided_slice %228 {offsets = [0, 32], sizes = [8, 32], strides = [1, 1]} : vector<8x128xf32> to vector<8x32xf32>
    %232 = vector.extract_strided_slice %229 {offsets = [0, 64], sizes = [8, 32], strides = [1, 1]} : vector<8x128xf32> to vector<8x32xf32>
    %233 = vector.extract_strided_slice %228 {offsets = [0, 96], sizes = [8, 32], strides = [1, 1]} : vector<8x128xf32> to vector<8x32xf32>
    %234 = arith.mulf %231, %199 : vector<8x32xf32>
    %235 = arith.mulf %230, %232 : vector<8x32xf32>
    %236 = arith.addf %234, %235 : vector<8x32xf32>
    %237 = math.tanh %236 : vector<8x32xf32>
    %238 = arith.mulf %233, %237 : vector<8x32xf32>
    %cst_44 = arith.constant dense<0.000000e+00> : vector<8x128xf32>
    %239 = tpu.matmul %238, %3, %cst_44 {dimension_numbers = #tpu.dot_dimension_numbers<[1], [0], [0], [1], [0, 0, 1, 1], [], []>} : vector<8x32xf32>, vector<32x128xf32>, vector<8x128xf32> -> vector<8x128xf32>
    %240 = vector.extract_strided_slice %15 {offsets = [48, 0], sizes = [8, 128], strides = [1, 1]} : vector<64x128xf32> to vector<8x128xf32>
    %cst_45 = arith.constant dense<0.000000e+00> : vector<8x128xf32>
    %241 = tpu.matmul %220, %1, %cst_45 {dimension_numbers = #tpu.dot_dimension_numbers<[1], [0], [0], [1], [0, 0, 1, 1], [], []>} : vector<8x32xf32>, vector<32x128xf32>, vector<8x128xf32> -> vector<8x128xf32>
    %242 = arith.addf %240, %241 : vector<8x128xf32>
    %243 = arith.negf %242 : vector<8x128xf32>
    %244 = math.exp %243 : vector<8x128xf32>
    %cst_46 = arith.constant 1.000000e+00 : f32
    %245 = vector.broadcast %cst_46 : f32 to vector<8x128xf32>
    %246 = arith.addf %245, %244 : vector<8x128xf32>
    %247 = arith.divf %245, %246 : vector<8x128xf32>
    %248 = math.tanh %242 : vector<8x128xf32>
    %249 = vector.extract_strided_slice %247 {offsets = [0, 0], sizes = [8, 32], strides = [1, 1]} : vector<8x128xf32> to vector<8x32xf32>
    %250 = vector.extract_strided_slice %247 {offsets = [0, 32], sizes = [8, 32], strides = [1, 1]} : vector<8x128xf32> to vector<8x32xf32>
    %251 = vector.extract_strided_slice %248 {offsets = [0, 64], sizes = [8, 32], strides = [1, 1]} : vector<8x128xf32> to vector<8x32xf32>
    %252 = vector.extract_strided_slice %247 {offsets = [0, 96], sizes = [8, 32], strides = [1, 1]} : vector<8x128xf32> to vector<8x32xf32>
    %253 = arith.mulf %250, %218 : vector<8x32xf32>
    %254 = arith.mulf %249, %251 : vector<8x32xf32>
    %255 = arith.addf %253, %254 : vector<8x32xf32>
    %256 = math.tanh %255 : vector<8x32xf32>
    %257 = arith.mulf %252, %256 : vector<8x32xf32>
    %cst_47 = arith.constant dense<0.000000e+00> : vector<8x128xf32>
    %258 = tpu.matmul %257, %2, %cst_47 {dimension_numbers = #tpu.dot_dimension_numbers<[1], [0], [0], [1], [0, 0, 1, 1], [], []>} : vector<8x32xf32>, vector<32x128xf32>, vector<8x128xf32> -> vector<8x128xf32>
    %259 = arith.addf %258, %239 : vector<8x128xf32>
    %260 = arith.addf %259, %9 : vector<8x128xf32>
    %261 = arith.negf %260 : vector<8x128xf32>
    %262 = math.exp %261 : vector<8x128xf32>
    %cst_48 = arith.constant 1.000000e+00 : f32
    %263 = vector.broadcast %cst_48 : f32 to vector<8x128xf32>
    %264 = arith.addf %263, %262 : vector<8x128xf32>
    %265 = arith.divf %263, %264 : vector<8x128xf32>
    %266 = math.tanh %260 : vector<8x128xf32>
    %267 = vector.extract_strided_slice %265 {offsets = [0, 0], sizes = [8, 32], strides = [1, 1]} : vector<8x128xf32> to vector<8x32xf32>
    %268 = vector.extract_strided_slice %265 {offsets = [0, 32], sizes = [8, 32], strides = [1, 1]} : vector<8x128xf32> to vector<8x32xf32>
    %269 = vector.extract_strided_slice %266 {offsets = [0, 64], sizes = [8, 32], strides = [1, 1]} : vector<8x128xf32> to vector<8x32xf32>
    %270 = vector.extract_strided_slice %265 {offsets = [0, 96], sizes = [8, 32], strides = [1, 1]} : vector<8x128xf32> to vector<8x32xf32>
    %271 = arith.mulf %268, %236 : vector<8x32xf32>
    %272 = arith.mulf %267, %269 : vector<8x32xf32>
    %273 = arith.addf %271, %272 : vector<8x32xf32>
    %274 = math.tanh %273 : vector<8x32xf32>
    %275 = arith.mulf %270, %274 : vector<8x32xf32>
    %cst_49 = arith.constant dense<0.000000e+00> : vector<8x128xf32>
    %276 = tpu.matmul %275, %3, %cst_49 {dimension_numbers = #tpu.dot_dimension_numbers<[1], [0], [0], [1], [0, 0, 1, 1], [], []>} : vector<8x32xf32>, vector<32x128xf32>, vector<8x128xf32> -> vector<8x128xf32>
    %277 = vector.extract_strided_slice %15 {offsets = [56, 0], sizes = [8, 128], strides = [1, 1]} : vector<64x128xf32> to vector<8x128xf32>
    %cst_50 = arith.constant dense<0.000000e+00> : vector<8x128xf32>
    %278 = tpu.matmul %257, %1, %cst_50 {dimension_numbers = #tpu.dot_dimension_numbers<[1], [0], [0], [1], [0, 0, 1, 1], [], []>} : vector<8x32xf32>, vector<32x128xf32>, vector<8x128xf32> -> vector<8x128xf32>
    %279 = arith.addf %277, %278 : vector<8x128xf32>
    %280 = arith.negf %279 : vector<8x128xf32>
    %281 = math.exp %280 : vector<8x128xf32>
    %cst_51 = arith.constant 1.000000e+00 : f32
    %282 = vector.broadcast %cst_51 : f32 to vector<8x128xf32>
    %283 = arith.addf %282, %281 : vector<8x128xf32>
    %284 = arith.divf %282, %283 : vector<8x128xf32>
    %285 = math.tanh %279 : vector<8x128xf32>
    %286 = vector.extract_strided_slice %284 {offsets = [0, 0], sizes = [8, 32], strides = [1, 1]} : vector<8x128xf32> to vector<8x32xf32>
    %287 = vector.extract_strided_slice %284 {offsets = [0, 32], sizes = [8, 32], strides = [1, 1]} : vector<8x128xf32> to vector<8x32xf32>
    %288 = vector.extract_strided_slice %285 {offsets = [0, 64], sizes = [8, 32], strides = [1, 1]} : vector<8x128xf32> to vector<8x32xf32>
    %289 = vector.extract_strided_slice %284 {offsets = [0, 96], sizes = [8, 32], strides = [1, 1]} : vector<8x128xf32> to vector<8x32xf32>
    %290 = arith.mulf %287, %255 : vector<8x32xf32>
    %291 = arith.mulf %286, %288 : vector<8x32xf32>
    %292 = arith.addf %290, %291 : vector<8x32xf32>
    %293 = math.tanh %292 : vector<8x32xf32>
    %294 = arith.mulf %289, %293 : vector<8x32xf32>
    %cst_52 = arith.constant dense<0.000000e+00> : vector<8x128xf32>
    %295 = tpu.matmul %294, %2, %cst_52 {dimension_numbers = #tpu.dot_dimension_numbers<[1], [0], [0], [1], [0, 0, 1, 1], [], []>} : vector<8x32xf32>, vector<32x128xf32>, vector<8x128xf32> -> vector<8x128xf32>
    %296 = arith.addf %295, %276 : vector<8x128xf32>
    %297 = arith.addf %296, %9 : vector<8x128xf32>
    %298 = arith.negf %297 : vector<8x128xf32>
    %299 = math.exp %298 : vector<8x128xf32>
    %cst_53 = arith.constant 1.000000e+00 : f32
    %300 = vector.broadcast %cst_53 : f32 to vector<8x128xf32>
    %301 = arith.addf %300, %299 : vector<8x128xf32>
    %302 = arith.divf %300, %301 : vector<8x128xf32>
    %303 = math.tanh %297 : vector<8x128xf32>
    %304 = vector.extract_strided_slice %302 {offsets = [0, 0], sizes = [8, 32], strides = [1, 1]} : vector<8x128xf32> to vector<8x32xf32>
    %305 = vector.extract_strided_slice %302 {offsets = [0, 32], sizes = [8, 32], strides = [1, 1]} : vector<8x128xf32> to vector<8x32xf32>
    %306 = vector.extract_strided_slice %303 {offsets = [0, 64], sizes = [8, 32], strides = [1, 1]} : vector<8x128xf32> to vector<8x32xf32>
    %307 = vector.extract_strided_slice %302 {offsets = [0, 96], sizes = [8, 32], strides = [1, 1]} : vector<8x128xf32> to vector<8x32xf32>
    %308 = arith.mulf %305, %273 : vector<8x32xf32>
    %309 = arith.mulf %304, %306 : vector<8x32xf32>
    %310 = arith.addf %308, %309 : vector<8x32xf32>
    %311 = math.tanh %310 : vector<8x32xf32>
    %312 = arith.mulf %307, %311 : vector<8x32xf32>
    %cst_54 = arith.constant dense<0.000000e+00> : vector<8x128xf32>
    %313 = tpu.matmul %312, %4, %cst_54 {dimension_numbers = #tpu.dot_dimension_numbers<[1], [0], [0], [1], [0, 0, 1, 1], [], []>} : vector<8x32xf32>, vector<32x128xf32>, vector<8x128xf32> -> vector<8x128xf32>
    %314 = vector.broadcast %10 : vector<1x128xf32> to vector<8x128xf32>
    %315 = arith.addf %313, %314 : vector<8x128xf32>
    %cst_55 = arith.constant 0.000000e+00 : f32
    %316 = vector.broadcast %cst_55 : f32 to vector<8x128xf32>
    %317 = arith.cmpf oge, %315, %316 : vector<8x128xf32>
    %cst_56 = arith.constant 5.000000e-02 : f32
    %318 = vector.broadcast %cst_56 : f32 to vector<8x128xf32>
    %319 = arith.mulf %318, %315 : vector<8x128xf32>
    %320 = arith.select %317, %315, %319 : vector<8x128xi1>, vector<8x128xf32>
    %cst_57 = arith.constant dense<0.000000e+00> : vector<8x128xf32>
    %321 = tpu.matmul %320, %5, %cst_57 {dimension_numbers = #tpu.dot_dimension_numbers<[1], [0], [0], [1], [0, 0, 1, 1], [], []>} : vector<8x128xf32>, vector<128x128xf32>, vector<8x128xf32> -> vector<8x128xf32>
    %322 = vector.broadcast %11 : vector<1x128xf32> to vector<8x128xf32>
    %323 = arith.addf %321, %322 : vector<8x128xf32>
    %324 = arith.negf %323 : vector<8x128xf32>
    %325 = math.exp %324 : vector<8x128xf32>
    %cst_58 = arith.constant 1.000000e+00 : f32
    %326 = vector.broadcast %cst_58 : f32 to vector<8x128xf32>
    %327 = arith.addf %326, %325 : vector<8x128xf32>
    %328 = arith.divf %326, %327 : vector<8x128xf32>
    %329 = vector.extract_strided_slice %328 {offsets = [0, 0], sizes = [2, 3], strides = [1, 1]} : vector<8x128xf32> to vector<2x3xf32>
    %c0_59 = arith.constant 0 : index
    %c0_60 = arith.constant 0 : index
    %330 = vector.load %arg3[%c0_59, %c0_60] : memref<2x3xf32, #tpu.memory_space<vmem>>, vector<2x3xf32>
    tpu.vector_store %arg3[%c0_59, %c0_60], %329 {strides = array<i32>} : memref<2x3xf32, #tpu.memory_space<vmem>>, vector<2x3xf32>,
    return
  }
}

</mosaic_0001>

<bundles_post_ra>
// kernel: tpu_custom_call.1
= control target key start
LH: loop header
LB: loop body
LE: loop exit
PB: predicated region body
PF: predicated region fallthrough
CT: control target
= control target key end

     0   :  { %8 = vsyncpa [#allocation3], 0  ;;  %s3805_s0 = inlined_call_operand.vmem [shape: f32[64,8], index: 0, kind: input, shape index: {}]   ;;  %s3806_s1 = inlined_call_operand.hbm [shape: f32[264,128], index: 1, kind: input, shape index: {}]   ;;  %s3807_s2 = inlined_call_operand.vmem [shape: f32[8,128], index: 2, kind: input, shape index: {}]   ;;  %s3808_s3 = inlined_call_operand.hbm [shape: f32[2,3], index: 3, kind: output, shape index: {}]  }
   0x1   :  { %9 = vsyncpa [#allocation4], 0  ;;  %s3274_s12 = smov [#allocation2]  }
   0x2   :  { %s17_s13 = sshll.u32 %s3274_s12, 4  ;;  %s18_s13 = int_to_ptr.vmem [resolvable:$true] %s17_s13 }
   0x3   :  { %s3238_s14 = scalar_lea.vmem %s18_s13, 4224  ;;  %p3243_p1 = scmp.lt.s32.totalorder %s18_s13, %s18_s13 }
   0x4   :  { %p3239_p0 = scmp.ne.s32.totalorder %s18_s13, %s3238_s14  ;;  %p3244_p2 = scmp.lt.s32.totalorder %s3238_s14, %s3238_s14 }
   0x6   :  { %p3245_p3 = por %p3244_p2, %p3243_p1 }
   0x8   :  { %p3246_p4 = pnand %p3245_p3, %p3239_p0 }
   0xa   :  { %3249 = shalt.err (!%p3246_p4)
}
   0xb   :  { %s3275_s15 = smov 128   ;;  %s3276_s16 = smov 8  }
   0xc   :  { %23 = dma.hbm_to_vmem [thread:$0]  %s3806_s1, 4224, %s18_s13, [#allocation3], %s3275_s15, %s3275_s15, %s3276_s16  }
   0xd   :  { %3270 = dma.done.wait [#allocation3], 4224  }
   0xe   :  { %3271 = vsyncadd [#allocation3], 4294963072  ;;  %v3277_v0 = vmov 0.0   ;;  %vm3278_vm0 = vmmov 0   ;;  %vm82_vm1 = vcmask 64512   ;;  %v29_v1 = vld [vmem:[#allocation2] sm:$0xff] }
   0xf   :  { %2800 = vmatprep.subr.mxu1 %v3277_v0  ;;  %2808 = vmatprep.mubr.msk.f32.mxu1 %vm3278_vm0, %v3277_v0  ;;  %v70_v2 = vld [vmem:[%s3805_s0] sm:$0xff]  ;;  %v71_v3 = vld [vmem:[%s3805_s0 + $0x8] sm:$0xff]  ;;  %v72_v5 = vld [vmem:[%s3805_s0 + $0x10] sm:$0xff]  ;;  %s3279_s8 = smov 64   ;;  %s3280_s9 = smov 32   ;;  %vm212_vm2 = vcmask 261120  }
  0x10   :  { %2753 = vmatprep.subr.mxu0 %v29_v1  ;;  %2755 = vmatprep.mubr.msk.f32.mxu0 %vm82_vm1, %v70_v2  ;;  %v3315_v4 = vld [vmem:[#allocation2 + $0x60] sm:$0xff]  ;;  %v3323_v6 = vld [vmem:[#allocation2 + $0x58] sm:$0xff]  ;;  %v3334_v9 = vld [vmem:[#allocation2 + $0x50] sm:$0xff]  ;;  %s3281_s18 = smov [#allocation5]   ;;  %vm2533_vm4 = vcmask 17408  }
  0x11   :  { %2754 = vmatpush3.msra.mxu0 %v29_v1  ;;  %2801 = vmatpush3.msra.mxu1 %v3315_v4  ;;  %v73_v7 = vld [vmem:[%s3805_s0 + $0x18] sm:$0xff]  ;;  %v74_v8 = vld [vmem:[%s3805_s0 + $0x20] sm:$0xff]  ;;  %v3341_v10 = vld [vmem:[#allocation2 + $0x48] sm:$0xff]  ;;  %s2541_s19 = sshll.u32 %s3281_s18, 4  ;;  %s2542_s19 = int_to_ptr.vmem [resolvable:$true] %s2541_s19 }
  0x12   :  { %2756 = vmatmul.mubr.msk.f32.vlgmr.msra.gmra.mxu0 %vm82_vm1, %v71_v3  ;;  %2767 = vmatprep.subr.mxu0 %v3277_v0  ;;  %v75_v11 = vld [vmem:[%s3805_s0 + $0x28] sm:$0xff]  ;;  %v76_v12 = vld [vmem:[%s3805_s0 + $0x30] sm:$0xff]  ;;  %v77_v13 = vld [vmem:[%s3805_s0 + $0x38] sm:$0xff]  ;;  %s3250_s20 = scalar_lea.vmem %s2542_s19, 32  ;;  %p3255_p6 = scmp.lt.s32.totalorder %s2542_s19, %s2542_s19 }
  0x13   :  { %2768 = vmatpush3.msra.mxu0 %v3315_v4  ;;  %2758 = vmatprep.mubr.msk.f32.mxu0 %vm82_vm1, %v72_v5  ;;  %v3367_v14 = vld [vmem:[#allocation2 + $0x20] sm:$0xff]  ;;  %v3370_v15 = vld [vmem:[#allocation2 + $0x18] sm:$0xff]  ;;  %v3376_v16 = vld [vmem:[#allocation2 + $0x10] sm:$0xff]  ;;  %p3251_p5 = scmp.ne.s32.totalorder %s2542_s19, %s3250_s20  ;;  %p3256_p7 = scmp.lt.s32.totalorder %s3250_s20, %s3250_s20 }
  0x14   :  { %2769 = vmatprep.subr.mxu0 %v3277_v0  ;;  %2802 = vmatprep.subr.mxu1 %v3277_v0  ;;  %v3380_v17 = vld [vmem:[#allocation2 + $0x8] sm:$0xff]  ;;  %v2551_v18 = vld [vmem:[%s3807_s2] ss:$0 sm:$0xff]  ;;  %v3415_v51 = vld [vmem:[#allocation2 + $0x38] sm:$0xff] }
  0x15   :  { %2770 = vmatpush3.msra.mxu0 %v3323_v6  ;;  %2803 = vmatpush3.msra.mxu1 %v3323_v6  ;;  %v3413_v50 = vld [vmem:[#allocation2 + $0x40] sm:$0xff]  ;;  %v3419_v52 = vld [vmem:[#allocation2 + $0x30] sm:$0xff]  ;;  %v3423_v53 = vld [vmem:[#allocation2 + $0x28] sm:$0xff]  ;;  %p3257_p8 = por %p3256_p7, %p3255_p6 }
  0x16   :  { %2759 = vmatmul.mubr.msk.f32.gmra.mxu0 %vm82_vm1, %v73_v7  ;;  %2771 = vmatprep.subr.mxu0 %v3277_v0  ;;  %v3456_v58 = vld [vmem:[%s3807_s2 + $0x1] ss:$0 sm:$0xff] }
  0x17   :  { %2761 = vmatprep.mubr.msk.f32.mxu0 %vm82_vm1, %v74_v8  ;;  %2772 = vmatpush3.msra.mxu0 %v3334_v9  ;;  %p3258_p9 = pnand %p3257_p8, %p3251_p5 }
  0x18   :  { %2773 = vmatprep.subr.mxu0 %v3277_v0  ;;  %2804 = vmatprep.subr.mxu1 %v3277_v0 }
  0x19   :  { %2774 = vmatpush3.msra.mxu0 %v3341_v10  ;;  %2805 = vmatpush3.msra.mxu1 %v3334_v9 }
  0x1a   :  { %2762 = vmatmul.mubr.msk.f32.gmra.mxu0 %vm82_vm1, %v75_v11  ;;  %2778 = vmatprep.subr.mxu0 %v3277_v0 }
  0x1b   :  { %2764 = vmatprep.mubr.msk.f32.mxu0 %vm82_vm1, %v76_v12  ;;  %2806 = vmatprep.subr.mxu1 %v3277_v0 }
  0x1c   :  { %2807 = vmatpush3.msra.mxu1 %v3341_v10 }
  0x1d   :  { %2822 = vmatprep.subr.mxu1 %v3277_v0 }
  0x1e   :  { %2765 = vmatmul.mubr.msk.f32.gmra.mxu0 %vm82_vm1, %v77_v13 }
  0x1f   :  { %2775 = vmatprep.mubr.msk.f32.mxu0 %vm3278_vm0, %v3277_v0 }
  0x22   :  { %2776 = vmatmul.mubr.f32.vlgmr.msra.gmra.mxu0 %v3277_v0 }
  0x23   :  { %2779 = vmatpush3.msra.mxu0 %v3367_v14  ;;  %2786 = vmatprep.mubr.msk.f32.mxu0 %vm3278_vm0, %v3277_v0 }
  0x24   :  { %2780 = vmatprep.subr.mxu0 %v3277_v0 }
  0x25   :  { %2781 = vmatpush3.msra.mxu0 %v3370_v15 }
  0x26   :  { %2782 = vmatprep.subr.mxu0 %v3277_v0 }
  0x27   :  { %2783 = vmatpush3.msra.mxu0 %v3376_v16 }
  0x28   :  { %2784 = vmatprep.subr.mxu0 %v3277_v0 }
  0x29   :  { %2785 = vmatpush3.msra.mxu0 %v3380_v17 }
  0x2a   :  { %2787 = vmatmul.mubr.f32.vlgmr.msra.gmra.mxu0 %v3277_v0  ;;  %2789 = vmatprep.subr.mxu0 %v3277_v0 }
  0x2b   :  { %2797 = vmatprep.mubr.msk.f32.mxu0 %vm3278_vm0, %v3277_v0  ;;  %2790 = vmatpush3.msra.mxu0 %v3413_v50 }
  0x2c   :  { %2791 = vmatprep.subr.mxu0 %v3277_v0 }
  0x2d   :  { %2792 = vmatpush3.msra.mxu0 %v3415_v51 }
  0x2e   :  { %2793 = vmatprep.subr.mxu0 %v3277_v0 }
  0x2f   :  { %2794 = vmatpush3.msra.mxu0 %v3419_v52 }
  0x30   :  { %2795 = vmatprep.subr.mxu0 %v3277_v0 }
  0x31   :  { %2796 = vmatpush3.msra.mxu0 %v3423_v53 }
  0x32   :  { %2811 = vmatprep.subr.mxu0 %v3277_v0 }
  0xd2   :  { %v2757_v19 = vpop.f32.mrf.mxu0 }
  0xd3   :  { %v3392_v20 = vadd.f32 %v2757_v19, %v2551_v18 }
  0xd4   :  { %v173_v21 = vpop.f32.mrf.mxu0 }
  0xd5   :  { %v174_v36 = vadd.f32 %v2551_v18, %v173_v21 }
  0xd6   :  { %v2760_v22 = vpop.f32.mrf.mxu0 }
  0xd7   :  { %v3394_v23 = vadd.f32 %v2760_v22, %v2551_v18 }
  0xd8   :  { %v183_v24 = vpop.f32.mrf.mxu0 }
  0xd9   :  { %v3396_v25 = vadd.f32 %v2551_v18, %v183_v24 }
  0xda   :  { %v2763_v26 = vpop.f32.mrf.mxu0 }
  0xdb   :  { %v3398_v27 = vadd.f32 %v2763_v26, %v2551_v18 }
  0xdc   :  { %v193_v28 = vpop.f32.mrf.mxu0 }
  0xdd   :  { %v3400_v29 = vadd.f32 %v2551_v18, %v193_v28 }
  0xde   :  { %v2766_v30 = vpop.f32.mrf.mxu0 }
  0xdf   :  { %v3402_v31 = vadd.f32 %v2766_v30, %v2551_v18 }
  0xe0   :  { %v203_v32 = vpop.f32.mrf.mxu0 }
  0xe1   :  { %v3404_v33 = vadd.f32 %v2551_v18, %v203_v32 }
  0xe2   :  { %v3406_v34 = vpop.f32.mrf.mxu0 }
  0xe4   :  { %v2777_v35 = vpop.f32.mrf.mxu0 }
  0xea   :  { %v352_v37 = vpop.f32.mrf.mxu0 }
  0xeb   :  { %v356_v38 = vadd.f32 %v352_v37, %v174_v36 }
  0xec   :  { %v2788_v39 = vpop.f32.mrf.mxu0 }
  0xed   :  { %3085 = vtanh.f32 %v356_v38  ;;  %v2560_v41 = vmul.f32 -1.442695, %v356_v38 }
  0xef   :  { %3087 = vpow2.f32 %v2560_v41 }
  0xfa   :  { %v3086_v40 = vpop.eup %3085 }
  0xfb   :  { %366 = vrot.lane.b32.xlu0 %v3086_v40, %s3279_s8 }
  0xfc   :  { %v3088_v42 = vpop.eup %3087 }
  0xfd   :  { %v360_v43 = vadd.f32 1.0, %v3088_v42 }
  0xff   :  { %3089 = vrcp.f32 %v360_v43 }
 0x10c   :  { %v3090_v44 = vpop.eup %3089 }
 0x10d   :  { %v364_v47 = vmul.f32 0.0, %v3090_v44 }
 0x16d   :  { %v367_v45 = vpop.permute.xlu0 %366 }
 0x16e   :  { %v369_v46 = vmul.f32 %v3090_v44, %v367_v45 }
 0x170   :  { %371 = vrot.lane.b32.xlu0 %v369_v46, %s3280_s9 }
 0x1e2   :  { %v372_v48 = vpop.permute.xlu0 %371 }
 0x1e3   :  { %v3410_v49 = vadd.f32 %v372_v48, %v364_v47 }
 0x1e5   :  { %3091 = vtanh.f32 %v3410_v49 }
 0x1f2   :  { %v3092_v54 = vpop.eup %3091 }
 0x1f3   :  { %377 = vrot.lane.b32.xlu1 %v3092_v54, %s3279_s8 }
 0x265   :  { %v378_v55 = vpop.permute.xlu1 %377 }
 0x266   :  { %v380_v56 = vmul.f32 %v3090_v44, %v378_v55 }
 0x268   :  { %382 = vrot.lane.b32.xlu1 %v380_v56, %s3280_s9 }
 0x2da   :  { %v383_v57 = vpop.permute.xlu1 %382 }
 0x2db   :  { %2798 = vmatmul.mubr.msk.f32.vlgmr.msra.gmra.mxu0 %vm212_vm2, %v383_v57 }
 0x2dc   :  { %2812 = vmatpush3.msra.mxu0 %v3367_v14  ;;  %2819 = vmatprep.mubr.msk.f32.mxu0 %vm3278_vm0, %v3277_v0 }
 0x2dd   :  { %2813 = vmatprep.subr.mxu0 %v3277_v0 }
 0x2de   :  { %2814 = vmatpush3.msra.mxu0 %v3370_v15 }
 0x2df   :  { %2815 = vmatprep.subr.mxu0 %v3277_v0 }
 0x2e0   :  { %2816 = vmatpush3.msra.mxu0 %v3376_v16 }
 0x2e1   :  { %2817 = vmatprep.subr.mxu0 %v3277_v0 }
 0x2e2   :  { %2818 = vmatpush3.msra.mxu0 %v3380_v17 }
 0x2e3   :  { %2820 = vmatmul.mubr.msk.f32.vlgmr.msra.gmra.mxu0 %vm212_vm2, %v383_v57  ;;  %2833 = vmatprep.subr.mxu0 %v3277_v0 }
 0x2e4   :  { %2834 = vmatpush3.msra.mxu0 %v3315_v4  ;;  %2841 = vmatprep.mubr.msk.f32.mxu0 %vm3278_vm0, %v3277_v0 }
 0x2e5   :  { %2835 = vmatprep.subr.mxu0 %v3277_v0 }
 0x2e6   :  { %2836 = vmatpush3.msra.mxu0 %v3323_v6 }
 0x2e7   :  { %2837 = vmatprep.subr.mxu0 %v3277_v0 }
 0x2e8   :  { %2838 = vmatpush3.msra.mxu0 %v3334_v9 }
 0x2e9   :  { %2839 = vmatprep.subr.mxu0 %v3277_v0 }
 0x2ea   :  { %2840 = vmatpush3.msra.mxu0 %v3341_v10 }
 0x2eb   :  { %2855 = vmatprep.subr.mxu0 %v3277_v0 }
 0x39b   :  { %v452_v59 = vpop.f32.mrf.mxu0 }
 0x39c   :  { %v453_v60 = vadd.f32 %v452_v59, %v3406_v34 }
 0x39d   :  { %v2799_v61 = vpop.f32.mrf.mxu0 }
 0x39e   :  { %v456_v62 = vadd.f32 %v3456_v58, %v453_v60 }
 0x3a0   :  { %3093 = vtanh.f32 %v456_v62  ;;  %v2562_v7 = vmul.f32 -1.442695, %v456_v62 }
 0x3a3   :  { %v622_v63 = vpop.f32.mrf.mxu0 }
 0x3a4   :  { %v626_v1 = vadd.f32 %v622_v63, %v3392_v20 }
 0x3a5   :  { %v2821_v2 = vpop.f32.mrf.mxu0 }
 0x3a6   :  { %3095 = vtanh.f32 %v626_v1  ;;  %v2565_v8 = vmul.f32 -1.442695, %v626_v1 }
 0x3a7   :  { %3097 = vpow2.f32 %v2562_v7 }
 0x3a8   :  { %3099 = vpow2.f32 %v2565_v8 }
 0x3ad   :  { %v3094_v3 = vpop.eup %3093 }
 0x3ae   :  { %466 = vrot.lane.b32.xlu0 %v3094_v3, %s3279_s8 }
 0x3b3   :  { %v3096_v5 = vpop.eup %3095 }
 0x3b4   :  { %636 = vrot.lane.b32.xlu1 %v3096_v5, %s3279_s8  ;;  %v3098_v11 = vpop.eup %3097 }
 0x3b5   :  { %v460_v12 = vadd.f32 1.0, %v3098_v11  ;;  %v3100_v13 = vpop.eup %3099 }
 0x3b6   :  { %v630_v18 = vadd.f32 1.0, %v3100_v13 }
 0x3b7   :  { %3101 = vrcp.f32 %v460_v12 }
 0x3b8   :  { %3103 = vrcp.f32 %v630_v18 }
 0x3c4   :  { %v3102_v19 = vpop.eup %3101 }
 0x3c5   :  { %v3104_v22 = vpop.eup %3103  ;;  %v464_v28 = vmul.f32 0.0, %v3102_v19 }
 0x3c6   :  { %v634_v34 = vmul.f32 %v3104_v22, %v3410_v49 }
 0x420   :  { %v467_v20 = vpop.permute.xlu0 %466 }
 0x421   :  { %v469_v21 = vmul.f32 %v3102_v19, %v467_v20 }
 0x423   :  { %471 = vrot.lane.b32.xlu0 %v469_v21, %s3280_s9 }
 0x426   :  { %v637_v24 = vpop.permute.xlu1 %636 }
 0x427   :  { %v639_v26 = vmul.f32 %v3104_v22, %v637_v24 }
 0x429   :  { %641 = vrot.lane.b32.xlu1 %v639_v26, %s3280_s9 }
 0x495   :  { %v472_v30 = vpop.permute.xlu0 %471 }
 0x496   :  { %v3465_v32 = vadd.f32 %v472_v30, %v464_v28 }
 0x498   :  { %3105 = vtanh.f32 %v3465_v32 }
 0x49b   :  { %v642_v35 = vpop.permute.xlu1 %641 }
 0x49c   :  { %v3469_v36 = vadd.f32 %v642_v35, %v634_v34 }
 0x49e   :  { %3107 = vtanh.f32 %v3469_v36 }
 0x4a5   :  { %v3106_v37 = vpop.eup %3105 }
 0x4a6   :  { %477 = vrot.lane.b32.xlu0 %v3106_v37, %s3279_s8 }
 0x4ab   :  { %v3108_v38 = vpop.eup %3107 }
 0x4ac   :  { %647 = vrot.lane.b32.xlu1 %v3108_v38, %s3279_s8 }
 0x518   :  { %v478_v39 = vpop.permute.xlu0 %477 }
 0x519   :  { %v480_v40 = vmul.f32 %v3102_v19, %v478_v39 }
 0x51b   :  { %482 = vrot.lane.b32.xlu0 %v480_v40, %s3280_s9 }
 0x51e   :  { %v648_v41 = vpop.permute.xlu1 %647 }
 0x51f   :  { %v650_v42 = vmul.f32 %v3104_v22, %v648_v41 }
 0x521   :  { %652 = vrot.lane.b32.xlu1 %v650_v42, %s3280_s9 }
 0x58d   :  { %v483_v43 = vpop.permute.xlu0 %482 }
 0x58e   :  { %2809 = vmatmul.mubr.msk.f32.vlgmr.msra.gmra.mxu1 %vm212_vm2, %v483_v43 }
 0x58f   :  { %2823 = vmatpush3.msra.mxu1 %v3413_v50  ;;  %2830 = vmatprep.mubr.msk.f32.mxu1 %vm3278_vm0, %v3277_v0 }
 0x590   :  { %2824 = vmatprep.subr.mxu1 %v3277_v0 }
 0x591   :  { %2825 = vmatpush3.msra.mxu1 %v3415_v51 }
 0x592   :  { %2826 = vmatprep.subr.mxu1 %v3277_v0 }
 0x593   :  { %2827 = vmatpush3.msra.mxu1 %v3419_v52  ;;  %v653_v44 = vpop.permute.xlu1 %652 }
 0x594   :  { %2828 = vmatprep.subr.mxu1 %v3277_v0 }
 0x595   :  { %2829 = vmatpush3.msra.mxu1 %v3423_v53 }
 0x596   :  { %2831 = vmatmul.mubr.msk.f32.vlgmr.msra.gmra.mxu1 %vm212_vm2, %v653_v44  ;;  %2844 = vmatprep.subr.mxu1 %v3277_v0 }
 0x597   :  { %2845 = vmatpush3.msra.mxu1 %v3367_v14  ;;  %2852 = vmatprep.mubr.msk.f32.mxu1 %vm3278_vm0, %v3277_v0 }
 0x598   :  { %2846 = vmatprep.subr.mxu1 %v3277_v0 }
 0x599   :  { %2847 = vmatpush3.msra.mxu1 %v3370_v15 }
 0x59a   :  { %2848 = vmatprep.subr.mxu1 %v3277_v0 }
 0x59b   :  { %2849 = vmatpush3.msra.mxu1 %v3376_v16 }
 0x59c   :  { %2850 = vmatprep.subr.mxu1 %v3277_v0 }
 0x59d   :  { %2851 = vmatpush3.msra.mxu1 %v3380_v17 }
 0x59e   :  { %2853 = vmatmul.mubr.msk.f32.vlgmr.msra.gmra.mxu1 %vm212_vm2, %v653_v44  ;;  %2866 = vmatprep.subr.mxu1 %v3277_v0 }
 0x59f   :  { %2867 = vmatpush3.msra.mxu1 %v3315_v4  ;;  %2874 = vmatprep.mubr.msk.f32.mxu1 %vm3278_vm0, %v3277_v0 }
 0x5a0   :  { %2868 = vmatprep.subr.mxu1 %v3277_v0 }
 0x5a1   :  { %2869 = vmatpush3.msra.mxu1 %v3323_v6 }
 0x5a2   :  { %2870 = vmatprep.subr.mxu1 %v3277_v0 }
 0x5a3   :  { %2871 = vmatpush3.msra.mxu1 %v3334_v9 }
 0x5a4   :  { %2872 = vmatprep.subr.mxu1 %v3277_v0 }
 0x5a5   :  { %2873 = vmatpush3.msra.mxu1 %v3341_v10 }
 0x5a6   :  { %2888 = vmatprep.subr.mxu1 %v3277_v0 }
 0x64e   :  { %v552_v45 = vpop.f32.mrf.mxu1 }
 0x650   :  { %v2810_v46 = vpop.f32.mrf.mxu1 }
 0x656   :  { %v722_v47 = vpop.f32.mrf.mxu1 }
 0x657   :  { %v723_v48 = vadd.f32 %v722_v47, %v552_v45 }
 0x658   :  { %v2832_v49 = vpop.f32.mrf.mxu1 }
 0x659   :  { %v726_v54 = vadd.f32 %v3456_v58, %v723_v48 }
 0x65b   :  { %3109 = vtanh.f32 %v726_v54  ;;  %v2567_v61 = vmul.f32 -1.442695, %v726_v54 }
 0x65e   :  { %v892_v55 = vpop.f32.mrf.mxu1 }
 0x65f   :  { %v896_v56 = vadd.f32 %v892_v55, %v3396_v25 }
 0x660   :  { %v2854_v57 = vpop.f32.mrf.mxu1 }
 0x661   :  { %3111 = vtanh.f32 %v896_v56  ;;  %v2570_v62 = vmul.f32 -1.442695, %v896_v56 }
 0x662   :  { %3113 = vpow2.f32 %v2567_v61 }
 0x663   :  { %3115 = vpow2.f32 %v2570_v62 }
 0x668   :  { %v3110_v59 = vpop.eup %3109 }
 0x669   :  { %736 = vrot.lane.b32.xlu0 %v3110_v59, %s3279_s8 }
 0x66e   :  { %v3112_v60 = vpop.eup %3111 }
 0x66f   :  { %906 = vrot.lane.b32.xlu1 %v3112_v60, %s3279_s8  ;;  %v3114_v63 = vpop.eup %3113 }
 0x670   :  { %v730_v1 = vadd.f32 1.0, %v3114_v63  ;;  %v3116_v2 = vpop.eup %3115 }
 0x671   :  { %v900_v3 = vadd.f32 1.0, %v3116_v2 }
 0x672   :  { %3117 = vrcp.f32 %v730_v1 }
 0x673   :  { %3119 = vrcp.f32 %v900_v3 }
 0x67f   :  { %v3118_v5 = vpop.eup %3117 }
 0x680   :  { %v3120_v8 = vpop.eup %3119  ;;  %v734_v13 = vmul.f32 %v3118_v5, %v3465_v32 }
 0x681   :  { %v904_v20 = vmul.f32 %v3120_v8, %v3469_v36 }
 0x6db   :  { %v737_v25 = vpop.permute.xlu0 %736 }
 0x6dc   :  { %v739_v7 = vmul.f32 %v3118_v5, %v737_v25 }
 0x6de   :  { %741 = vrot.lane.b32.xlu0 %v739_v7, %s3280_s9 }
 0x6e1   :  { %v907_v11 = vpop.permute.xlu1 %906 }
 0x6e2   :  { %v909_v12 = vmul.f32 %v3120_v8, %v907_v11 }
 0x6e4   :  { %911 = vrot.lane.b32.xlu1 %v909_v12, %s3280_s9 }
 0x750   :  { %v742_v18 = vpop.permute.xlu0 %741 }
 0x751   :  { %v3516_v19 = vadd.f32 %v742_v18, %v734_v13 }
 0x753   :  { %3121 = vtanh.f32 %v3516_v19 }
 0x756   :  { %v912_v21 = vpop.permute.xlu1 %911 }
 0x757   :  { %v3520_v22 = vadd.f32 %v912_v21, %v904_v20 }
 0x759   :  { %3123 = vtanh.f32 %v3520_v22 }
 0x760   :  { %v3122_v24 = vpop.eup %3121 }
 0x761   :  { %747 = vrot.lane.b32.xlu0 %v3122_v24, %s3279_s8 }
 0x766   :  { %v3124_v26 = vpop.eup %3123 }
 0x767   :  { %917 = vrot.lane.b32.xlu1 %v3124_v26, %s3279_s8 }
 0x7d3   :  { %v748_v28 = vpop.permute.xlu0 %747 }
 0x7d4   :  { %v750_v30 = vmul.f32 %v3118_v5, %v748_v28 }
 0x7d6   :  { %752 = vrot.lane.b32.xlu0 %v750_v30, %s3280_s9 }
 0x7d9   :  { %v918_v32 = vpop.permute.xlu1 %917 }
 0x7da   :  { %v920_v34 = vmul.f32 %v3120_v8, %v918_v32 }
 0x7dc   :  { %922 = vrot.lane.b32.xlu1 %v920_v34, %s3280_s9 }
 0x848   :  { %v753_v35 = vpop.permute.xlu0 %752 }
 0x849   :  { %2842 = vmatmul.mubr.msk.f32.vlgmr.msra.gmra.mxu0 %vm212_vm2, %v753_v35 }
 0x84a   :  { %2856 = vmatpush3.msra.mxu0 %v3413_v50  ;;  %2863 = vmatprep.mubr.msk.f32.mxu0 %vm3278_vm0, %v3277_v0 }
 0x84b   :  { %2857 = vmatprep.subr.mxu0 %v3277_v0 }
 0x84c   :  { %2858 = vmatpush3.msra.mxu0 %v3415_v51 }
 0x84d   :  { %2859 = vmatprep.subr.mxu0 %v3277_v0 }
 0x84e   :  { %2860 = vmatpush3.msra.mxu0 %v3419_v52  ;;  %v923_v36 = vpop.permute.xlu1 %922 }
 0x84f   :  { %2861 = vmatprep.subr.mxu0 %v3277_v0 }
 0x850   :  { %2862 = vmatpush3.msra.mxu0 %v3423_v53 }
 0x851   :  { %2864 = vmatmul.mubr.msk.f32.vlgmr.msra.gmra.mxu0 %vm212_vm2, %v923_v36  ;;  %2877 = vmatprep.subr.mxu0 %v3277_v0 }
 0x852   :  { %2878 = vmatpush3.msra.mxu0 %v3367_v14  ;;  %2885 = vmatprep.mubr.msk.f32.mxu0 %vm3278_vm0, %v3277_v0 }
 0x853   :  { %2879 = vmatprep.subr.mxu0 %v3277_v0 }
 0x854   :  { %2880 = vmatpush3.msra.mxu0 %v3370_v15 }
 0x855   :  { %2881 = vmatprep.subr.mxu0 %v3277_v0 }
 0x856   :  { %2882 = vmatpush3.msra.mxu0 %v3376_v16 }
 0x857   :  { %2883 = vmatprep.subr.mxu0 %v3277_v0 }
 0x858   :  { %2884 = vmatpush3.msra.mxu0 %v3380_v17 }
 0x859   :  { %2886 = vmatmul.mubr.msk.f32.vlgmr.msra.gmra.mxu0 %vm212_vm2, %v923_v36  ;;  %2899 = vmatprep.subr.mxu0 %v3277_v0 }
 0x85a   :  { %2900 = vmatpush3.msra.mxu0 %v3315_v4  ;;  %2907 = vmatprep.mubr.msk.f32.mxu0 %vm3278_vm0, %v3277_v0 }
 0x85b   :  { %2901 = vmatprep.subr.mxu0 %v3277_v0 }
 0x85c   :  { %2902 = vmatpush3.msra.mxu0 %v3323_v6 }
 0x85d   :  { %2903 = vmatprep.subr.mxu0 %v3277_v0 }
 0x85e   :  { %2904 = vmatpush3.msra.mxu0 %v3334_v9 }
 0x85f   :  { %2905 = vmatprep.subr.mxu0 %v3277_v0 }
 0x860   :  { %2906 = vmatpush3.msra.mxu0 %v3341_v10 }
 0x861   :  { %2921 = vmatprep.subr.mxu0 %v3277_v0 }
 0x909   :  { %v822_v37 = vpop.f32.mrf.mxu0 }
 0x90b   :  { %v2843_v38 = vpop.f32.mrf.mxu0 }
 0x911   :  { %v992_v39 = vpop.f32.mrf.mxu0 }
 0x912   :  { %v993_v40 = vadd.f32 %v992_v39, %v822_v37 }
 0x913   :  { %v2865_v41 = vpop.f32.mrf.mxu0 }
 0x914   :  { %v996_v42 = vadd.f32 %v3456_v58, %v993_v40 }
 0x916   :  { %3125 = vtanh.f32 %v996_v42  ;;  %v2572_v48 = vmul.f32 -1.442695, %v996_v42 }
 0x919   :  { %v1162_v43 = vpop.f32.mrf.mxu0 }
 0x91a   :  { %v1166_v44 = vadd.f32 %v1162_v43, %v3394_v23 }
 0x91b   :  { %v2887_v45 = vpop.f32.mrf.mxu0 }
 0x91c   :  { %3127 = vtanh.f32 %v1166_v44  ;;  %v2575_v49 = vmul.f32 -1.442695, %v1166_v44 }
 0x91d   :  { %3129 = vpow2.f32 %v2572_v48 }
 0x91e   :  { %3131 = vpow2.f32 %v2575_v49 }
 0x923   :  { %v3126_v46 = vpop.eup %3125 }
 0x924   :  { %1006 = vrot.lane.b32.xlu0 %v3126_v46, %s3279_s8 }
 0x929   :  { %v3128_v47 = vpop.eup %3127 }
 0x92a   :  { %1176 = vrot.lane.b32.xlu1 %v3128_v47, %s3279_s8  ;;  %v3130_v54 = vpop.eup %3129 }
 0x92b   :  { %v1000_v55 = vadd.f32 1.0, %v3130_v54  ;;  %v3132_v56 = vpop.eup %3131 }
 0x92c   :  { %v1170_v57 = vadd.f32 1.0, %v3132_v56 }
 0x92d   :  { %3133 = vrcp.f32 %v1000_v55 }
 0x92e   :  { %3135 = vrcp.f32 %v1170_v57 }
 0x93a   :  { %v3134_v59 = vpop.eup %3133 }
 0x93b   :  { %v3136_v61 = vpop.eup %3135  ;;  %v1004_v1 = vmul.f32 %v3134_v59, %v3516_v19 }
 0x93c   :  { %v1174_v5 = vmul.f32 %v3136_v61, %v3520_v22 }
 0x996   :  { %v1007_v23 = vpop.permute.xlu0 %1006 }
 0x997   :  { %v1009_v60 = vmul.f32 %v3134_v59, %v1007_v23 }
 0x999   :  { %1011 = vrot.lane.b32.xlu0 %v1009_v60, %s3280_s9 }
 0x99c   :  { %v1177_v62 = vpop.permute.xlu1 %1176 }
 0x99d   :  { %v1179_v63 = vmul.f32 %v3136_v61, %v1177_v62 }
 0x99f   :  { %1181 = vrot.lane.b32.xlu1 %v1179_v63, %s3280_s9 }
 0xa0b   :  { %v1012_v2 = vpop.permute.xlu0 %1011 }
 0xa0c   :  { %v3567_v3 = vadd.f32 %v1012_v2, %v1004_v1 }
 0xa0e   :  { %3137 = vtanh.f32 %v3567_v3 }
 0xa11   :  { %v1182_v25 = vpop.permute.xlu1 %1181 }
 0xa12   :  { %v3571_v7 = vadd.f32 %v1182_v25, %v1174_v5 }
 0xa14   :  { %3139 = vtanh.f32 %v3571_v7 }
 0xa1b   :  { %v3138_v8 = vpop.eup %3137 }
 0xa1c   :  { %1017 = vrot.lane.b32.xlu0 %v3138_v8, %s3279_s8 }
 0xa21   :  { %v3140_v11 = vpop.eup %3139 }
 0xa22   :  { %1187 = vrot.lane.b32.xlu1 %v3140_v11, %s3279_s8 }
 0xa8e   :  { %v1018_v12 = vpop.permute.xlu0 %1017 }
 0xa8f   :  { %v1020_v13 = vmul.f32 %v3134_v59, %v1018_v12 }
 0xa91   :  { %1022 = vrot.lane.b32.xlu0 %v1020_v13, %s3280_s9 }
 0xa94   :  { %v1188_v18 = vpop.permute.xlu1 %1187 }
 0xa95   :  { %v1190_v19 = vmul.f32 %v3136_v61, %v1188_v18 }
 0xa97   :  { %1192 = vrot.lane.b32.xlu1 %v1190_v19, %s3280_s9 }
 0xb03   :  { %v1023_v20 = vpop.permute.xlu0 %1022 }
 0xb04   :  { %2875 = vmatmul.mubr.msk.f32.vlgmr.msra.gmra.mxu1 %vm212_vm2, %v1023_v20 }
 0xb05   :  { %2889 = vmatpush3.msra.mxu1 %v3413_v50  ;;  %2896 = vmatprep.mubr.msk.f32.mxu1 %vm3278_vm0, %v3277_v0 }
 0xb06   :  { %2890 = vmatprep.subr.mxu1 %v3277_v0 }
 0xb07   :  { %2891 = vmatpush3.msra.mxu1 %v3415_v51 }
 0xb08   :  { %2892 = vmatprep.subr.mxu1 %v3277_v0 }
 0xb09   :  { %2893 = vmatpush3.msra.mxu1 %v3419_v52  ;;  %v1193_v21 = vpop.permute.xlu1 %1192 }
 0xb0a   :  { %2894 = vmatprep.subr.mxu1 %v3277_v0 }
 0xb0b   :  { %2895 = vmatpush3.msra.mxu1 %v3423_v53 }
 0xb0c   :  { %2897 = vmatmul.mubr.msk.f32.vlgmr.msra.gmra.mxu1 %vm212_vm2, %v1193_v21  ;;  %2910 = vmatprep.subr.mxu1 %v3277_v0 }
 0xb0d   :  { %2911 = vmatpush3.msra.mxu1 %v3367_v14  ;;  %2918 = vmatprep.mubr.msk.f32.mxu1 %vm3278_vm0, %v3277_v0 }
 0xb0e   :  { %2912 = vmatprep.subr.mxu1 %v3277_v0 }
 0xb0f   :  { %2913 = vmatpush3.msra.mxu1 %v3370_v15 }
 0xb10   :  { %2914 = vmatprep.subr.mxu1 %v3277_v0 }
 0xb11   :  { %2915 = vmatpush3.msra.mxu1 %v3376_v16 }
 0xb12   :  { %2916 = vmatprep.subr.mxu1 %v3277_v0 }
 0xb13   :  { %2917 = vmatpush3.msra.mxu1 %v3380_v17 }
 0xb14   :  { %2919 = vmatmul.mubr.msk.f32.vlgmr.msra.gmra.mxu1 %vm212_vm2, %v1193_v21  ;;  %2932 = vmatprep.subr.mxu1 %v3277_v0 }
 0xb15   :  { %2933 = vmatpush3.msra.mxu1 %v3315_v4  ;;  %2940 = vmatprep.mubr.msk.f32.mxu1 %vm3278_vm0, %v3277_v0 }
 0xb16   :  { %2934 = vmatprep.subr.mxu1 %v3277_v0 }
 0xb17   :  { %2935 = vmatpush3.msra.mxu1 %v3323_v6 }
 0xb18   :  { %2936 = vmatprep.subr.mxu1 %v3277_v0 }
 0xb19   :  { %2937 = vmatpush3.msra.mxu1 %v3334_v9 }
 0xb1a   :  { %2938 = vmatprep.subr.mxu1 %v3277_v0 }
 0xb1b   :  { %2939 = vmatpush3.msra.mxu1 %v3341_v10 }
 0xb1c   :  { %2954 = vmatprep.subr.mxu1 %v3277_v0 }
 0xbc4   :  { %v1092_v22 = vpop.f32.mrf.mxu1 }
 0xbc6   :  { %v2876_v24 = vpop.f32.mrf.mxu1 }
 0xbcc   :  { %v1262_v26 = vpop.f32.mrf.mxu1 }
 0xbcd   :  { %v1263_v28 = vadd.f32 %v1262_v26, %v1092_v22 }
 0xbce   :  { %v2898_v30 = vpop.f32.mrf.mxu1 }
 0xbcf   :  { %v1266_v32 = vadd.f32 %v3456_v58, %v1263_v28 }
 0xbd1   :  { %3141 = vtanh.f32 %v1266_v32  ;;  %v2577_v39 = vmul.f32 -1.442695, %v1266_v32 }
 0xbd4   :  { %v1432_v34 = vpop.f32.mrf.mxu1 }
 0xbd5   :  { %v1436_v35 = vadd.f32 %v1432_v34, %v3400_v29 }
 0xbd6   :  { %v2920_v36 = vpop.f32.mrf.mxu1 }
 0xbd7   :  { %3143 = vtanh.f32 %v1436_v35  ;;  %v2580_v40 = vmul.f32 -1.442695, %v1436_v35 }
 0xbd8   :  { %3145 = vpow2.f32 %v2577_v39 }
 0xbd9   :  { %3147 = vpow2.f32 %v2580_v40 }
 0xbde   :  { %v3142_v37 = vpop.eup %3141 }
 0xbdf   :  { %1276 = vrot.lane.b32.xlu0 %v3142_v37, %s3279_s8 }
 0xbe4   :  { %v3144_v38 = vpop.eup %3143 }
 0xbe5   :  { %1446 = vrot.lane.b32.xlu1 %v3144_v38, %s3279_s8  ;;  %v3146_v41 = vpop.eup %3145 }
 0xbe6   :  { %v1270_v42 = vadd.f32 1.0, %v3146_v41  ;;  %v3148_v43 = vpop.eup %3147 }
 0xbe7   :  { %v1440_v44 = vadd.f32 1.0, %v3148_v43 }
 0xbe8   :  { %3149 = vrcp.f32 %v1270_v42 }
 0xbe9   :  { %3151 = vrcp.f32 %v1440_v44 }
 0xbf5   :  { %v3150_v45 = vpop.eup %3149 }
 0xbf6   :  { %v3152_v47 = vpop.eup %3151  ;;  %v1274_v54 = vmul.f32 %v3150_v45, %v3567_v3 }
 0xbf7   :  { %v1444_v57 = vmul.f32 %v3152_v47, %v3571_v7 }
 0xc51   :  { %v1277_v29 = vpop.permute.xlu0 %1276 }
 0xc52   :  { %v1279_v46 = vmul.f32 %v3150_v45, %v1277_v29 }
 0xc54   :  { %1281 = vrot.lane.b32.xlu0 %v1279_v46, %s3280_s9 }
 0xc57   :  { %v1447_v48 = vpop.permute.xlu1 %1446 }
 0xc58   :  { %v1449_v49 = vmul.f32 %v3152_v47, %v1447_v48 }
 0xc5a   :  { %1451 = vrot.lane.b32.xlu1 %v1449_v49, %s3280_s9 }
 0xcc6   :  { %v1282_v55 = vpop.permute.xlu0 %1281 }
 0xcc7   :  { %v3618_v56 = vadd.f32 %v1282_v55, %v1274_v54 }
 0xcc9   :  { %3153 = vtanh.f32 %v3618_v56 }
 0xccc   :  { %v1452_v59 = vpop.permute.xlu1 %1451 }
 0xccd   :  { %v3622_v23 = vadd.f32 %v1452_v59, %v1444_v57 }
 0xccf   :  { %3155 = vtanh.f32 %v3622_v23 }
 0xcd6   :  { %v3154_v60 = vpop.eup %3153 }
 0xcd7   :  { %1287 = vrot.lane.b32.xlu0 %v3154_v60, %s3279_s8 }
 0xcdc   :  { %v3156_v61 = vpop.eup %3155 }
 0xcdd   :  { %1457 = vrot.lane.b32.xlu1 %v3156_v61, %s3279_s8 }
 0xd49   :  { %v1288_v62 = vpop.permute.xlu0 %1287 }
 0xd4a   :  { %v1290_v63 = vmul.f32 %v3150_v45, %v1288_v62 }
 0xd4c   :  { %1292 = vrot.lane.b32.xlu0 %v1290_v63, %s3280_s9 }
 0xd4f   :  { %v1458_v1 = vpop.permute.xlu1 %1457 }
 0xd50   :  { %v1460_v2 = vmul.f32 %v3152_v47, %v1458_v1 }
 0xd52   :  { %1462 = vrot.lane.b32.xlu1 %v1460_v2, %s3280_s9 }
 0xdbe   :  { %v1293_v3 = vpop.permute.xlu0 %1292 }
 0xdbf   :  { %2908 = vmatmul.mubr.msk.f32.vlgmr.msra.gmra.mxu0 %vm212_vm2, %v1293_v3 }
 0xdc0   :  { %2922 = vmatpush3.msra.mxu0 %v3413_v50  ;;  %2929 = vmatprep.mubr.msk.f32.mxu0 %vm3278_vm0, %v3277_v0 }
 0xdc1   :  { %2923 = vmatprep.subr.mxu0 %v3277_v0 }
 0xdc2   :  { %2924 = vmatpush3.msra.mxu0 %v3415_v51 }
 0xdc3   :  { %2925 = vmatprep.subr.mxu0 %v3277_v0 }
 0xdc4   :  { %2926 = vmatpush3.msra.mxu0 %v3419_v52  ;;  %v1463_v5 = vpop.permute.xlu1 %1462 }
 0xdc5   :  { %2927 = vmatprep.subr.mxu0 %v3277_v0 }
 0xdc6   :  { %2928 = vmatpush3.msra.mxu0 %v3423_v53 }
 0xdc7   :  { %2930 = vmatmul.mubr.msk.f32.vlgmr.msra.gmra.mxu0 %vm212_vm2, %v1463_v5  ;;  %2943 = vmatprep.subr.mxu0 %v3277_v0 }
 0xdc8   :  { %2944 = vmatpush3.msra.mxu0 %v3367_v14  ;;  %2951 = vmatprep.mubr.msk.f32.mxu0 %vm3278_vm0, %v3277_v0 }
 0xdc9   :  { %2945 = vmatprep.subr.mxu0 %v3277_v0 }
 0xdca   :  { %2946 = vmatpush3.msra.mxu0 %v3370_v15 }
 0xdcb   :  { %2947 = vmatprep.subr.mxu0 %v3277_v0 }
 0xdcc   :  { %2948 = vmatpush3.msra.mxu0 %v3376_v16 }
 0xdcd   :  { %2949 = vmatprep.subr.mxu0 %v3277_v0 }
 0xdce   :  { %2950 = vmatpush3.msra.mxu0 %v3380_v17 }
 0xdcf   :  { %2952 = vmatmul.mubr.msk.f32.vlgmr.msra.gmra.mxu0 %vm212_vm2, %v1463_v5  ;;  %2965 = vmatprep.subr.mxu0 %v3277_v0 }
 0xdd0   :  { %2966 = vmatpush3.msra.mxu0 %v3315_v4  ;;  %2973 = vmatprep.mubr.msk.f32.mxu0 %vm3278_vm0, %v3277_v0 }
 0xdd1   :  { %2967 = vmatprep.subr.mxu0 %v3277_v0 }
 0xdd2   :  { %2968 = vmatpush3.msra.mxu0 %v3323_v6 }
 0xdd3   :  { %2969 = vmatprep.subr.mxu0 %v3277_v0 }
 0xdd4   :  { %2970 = vmatpush3.msra.mxu0 %v3334_v9 }
 0xdd5   :  { %2971 = vmatprep.subr.mxu0 %v3277_v0 }
 0xdd6   :  { %2972 = vmatpush3.msra.mxu0 %v3341_v10 }
 0xdd7   :  { %2987 = vmatprep.subr.mxu0 %v3277_v0 }
 0xe7f   :  { %v1362_v25 = vpop.f32.mrf.mxu0 }
 0xe81   :  { %v2909_v7 = vpop.f32.mrf.mxu0 }
 0xe87   :  { %v1532_v4 = vpop.f32.mrf.mxu0 }
 0xe88   :  { %v1533_v8 = vadd.f32 %v1532_v4, %v1362_v25 }
 0xe89   :  { %v2931_v11 = vpop.f32.mrf.mxu0 }
 0xe8a   :  { %v1536_v12 = vadd.f32 %v3456_v58, %v1533_v8 }
 0xe8c   :  { %3157 = vtanh.f32 %v1536_v12  ;;  %v2582_v10 = vmul.f32 -1.442695, %v1536_v12 }
 0xe8f   :  { %v1702_v13 = vpop.f32.mrf.mxu0 }
 0xe90   :  { %v1706_v6 = vadd.f32 %v1702_v13, %v3398_v27 }
 0xe91   :  { %v2953_v18 = vpop.f32.mrf.mxu0 }
 0xe92   :  { %3159 = vtanh.f32 %v1706_v6  ;;  %v2585_v20 = vmul.f32 -1.442695, %v1706_v6 }
 0xe93   :  { %3161 = vpow2.f32 %v2582_v10 }
 0xe94   :  { %3163 = vpow2.f32 %v2585_v20 }
 0xe99   :  { %v3158_v9 = vpop.eup %3157 }
 0xe9a   :  { %1546 = vrot.lane.b32.xlu0 %v3158_v9, %s3279_s8 }
 0xe9f   :  { %v3160_v19 = vpop.eup %3159 }
 0xea0   :  { %1716 = vrot.lane.b32.xlu1 %v3160_v19, %s3279_s8  ;;  %v3162_v21 = vpop.eup %3161 }
 0xea1   :  { %v1540_v22 = vadd.f32 1.0, %v3162_v21  ;;  %v3164_v24 = vpop.eup %3163 }
 0xea2   :  { %v1710_v26 = vadd.f32 1.0, %v3164_v24 }
 0xea3   :  { %3165 = vrcp.f32 %v1540_v22 }
 0xea4   :  { %3167 = vrcp.f32 %v1710_v26 }
 0xeb0   :  { %v3166_v28 = vpop.eup %3165 }
 0xeb1   :  { %v3168_v32 = vpop.eup %3167  ;;  %v1544_v36 = vmul.f32 %v3166_v28, %v3618_v56 }
 0xeb2   :  { %v1714_v39 = vmul.f32 %v3168_v32, %v3622_v23 }
 0xf0c   :  { %v1547_v27 = vpop.permute.xlu0 %1546 }
 0xf0d   :  { %v1549_v30 = vmul.f32 %v3166_v28, %v1547_v27 }
 0xf0f   :  { %1551 = vrot.lane.b32.xlu0 %v1549_v30, %s3280_s9 }
 0xf12   :  { %v1717_v34 = vpop.permute.xlu1 %1716 }
 0xf13   :  { %v1719_v35 = vmul.f32 %v3168_v32, %v1717_v34 }
 0xf15   :  { %1721 = vrot.lane.b32.xlu1 %v1719_v35, %s3280_s9 }
 0xf81   :  { %v1552_v37 = vpop.permute.xlu0 %1551 }
 0xf82   :  { %v3669_v38 = vadd.f32 %v1552_v37, %v1544_v36 }
 0xf84   :  { %3169 = vtanh.f32 %v3669_v38 }
 0xf87   :  { %v1722_v40 = vpop.permute.xlu1 %1721 }
 0xf88   :  { %v3673_v41 = vadd.f32 %v1722_v40, %v1714_v39 }
 0xf8a   :  { %3171 = vtanh.f32 %v3673_v41 }
 0xf91   :  { %v3170_v42 = vpop.eup %3169 }
 0xf92   :  { %1557 = vrot.lane.b32.xlu0 %v3170_v42, %s3279_s8 }
 0xf97   :  { %v3172_v43 = vpop.eup %3171 }
 0xf98   :  { %1727 = vrot.lane.b32.xlu1 %v3172_v43, %s3279_s8 }
0x1004   :  { %v1558_v44 = vpop.permute.xlu0 %1557 }
0x1005   :  { %v1560_v45 = vmul.f32 %v3166_v28, %v1558_v44 }
0x1007   :  { %1562 = vrot.lane.b32.xlu0 %v1560_v45, %s3280_s9 }
0x100a   :  { %v1728_v29 = vpop.permute.xlu1 %1727 }
0x100b   :  { %v1730_v46 = vmul.f32 %v3168_v32, %v1728_v29 }
0x100d   :  { %1732 = vrot.lane.b32.xlu1 %v1730_v46, %s3280_s9 }
0x1079   :  { %v1563_v47 = vpop.permute.xlu0 %1562 }
0x107a   :  { %2941 = vmatmul.mubr.msk.f32.vlgmr.msra.gmra.mxu1 %vm212_vm2, %v1563_v47 }
0x107b   :  { %2955 = vmatpush3.msra.mxu1 %v3413_v50  ;;  %2962 = vmatprep.mubr.msk.f32.mxu1 %vm3278_vm0, %v3277_v0 }
0x107c   :  { %2956 = vmatprep.subr.mxu1 %v3277_v0 }
0x107d   :  { %2957 = vmatpush3.msra.mxu1 %v3415_v51 }
0x107e   :  { %2958 = vmatprep.subr.mxu1 %v3277_v0 }
0x107f   :  { %2959 = vmatpush3.msra.mxu1 %v3419_v52  ;;  %v1733_v48 = vpop.permute.xlu1 %1732 }
0x1080   :  { %2960 = vmatprep.subr.mxu1 %v3277_v0 }
0x1081   :  { %2961 = vmatpush3.msra.mxu1 %v3423_v53 }
0x1082   :  { %2963 = vmatmul.mubr.msk.f32.vlgmr.msra.gmra.mxu1 %vm212_vm2, %v1733_v48  ;;  %2976 = vmatprep.subr.mxu1 %v3277_v0 }
0x1083   :  { %2977 = vmatpush3.msra.mxu1 %v3367_v14  ;;  %2984 = vmatprep.mubr.msk.f32.mxu1 %vm3278_vm0, %v3277_v0  ;;  %v3217_v14 = vld [vmem:[#allocation2 + $0x60] sm:$0xff] }
0x1084   :  { %2978 = vmatprep.subr.mxu1 %v3277_v0 }
0x1085   :  { %2979 = vmatpush3.msra.mxu1 %v3370_v15  ;;  %v3218_v15 = vld [vmem:[#allocation2 + $0x58] sm:$0xff] }
0x1086   :  { %2980 = vmatprep.subr.mxu1 %v3277_v0 }
0x1087   :  { %2981 = vmatpush3.msra.mxu1 %v3376_v16  ;;  %v3219_v16 = vld [vmem:[#allocation2 + $0x50] sm:$0xff] }
0x1088   :  { %2982 = vmatprep.subr.mxu1 %v3277_v0 }
0x1089   :  { %2983 = vmatpush3.msra.mxu1 %v3380_v17  ;;  %v3220_v17 = vld [vmem:[#allocation2 + $0x48] sm:$0xff] }
0x108a   :  { %2985 = vmatmul.mubr.msk.f32.vlgmr.msra.gmra.mxu1 %vm212_vm2, %v1733_v48  ;;  %2998 = vmatprep.subr.mxu1 %v3277_v0 }
0x108b   :  { %2999 = vmatpush3.msra.mxu1 %v3217_v14  ;;  %3006 = vmatprep.mubr.msk.f32.mxu1 %vm3278_vm0, %v3277_v0 }
0x108c   :  { %3000 = vmatprep.subr.mxu1 %v3277_v0 }
0x108d   :  { %3001 = vmatpush3.msra.mxu1 %v3218_v15 }
0x108e   :  { %3002 = vmatprep.subr.mxu1 %v3277_v0 }
0x108f   :  { %3003 = vmatpush3.msra.mxu1 %v3219_v16 }
0x1090   :  { %3004 = vmatprep.subr.mxu1 %v3277_v0 }
0x1091   :  { %3005 = vmatpush3.msra.mxu1 %v3220_v17 }
0x1092   :  { %3020 = vmatprep.subr.mxu1 %v3277_v0 }
0x113a   :  { %v1632_v49 = vpop.f32.mrf.mxu1 }
0x113c   :  { %v2942_v54 = vpop.f32.mrf.mxu1 }
0x1142   :  { %v1802_v55 = vpop.f32.mrf.mxu1 }
0x1143   :  { %v1803_v56 = vadd.f32 %v1802_v55, %v1632_v49 }
0x1144   :  { %v2964_v57 = vpop.f32.mrf.mxu1 }
0x1145   :  { %v1806_v59 = vadd.f32 %v3456_v58, %v1803_v56 }
0x1147   :  { %3173 = vtanh.f32 %v1806_v59  ;;  %v2587_v1 = vmul.f32 -1.442695, %v1806_v59 }
0x114a   :  { %v1972_v23 = vpop.f32.mrf.mxu1 }
0x114b   :  { %v1976_v60 = vadd.f32 %v1972_v23, %v3404_v33 }
0x114c   :  { %v2986_v61 = vpop.f32.mrf.mxu1 }
0x114d   :  { %3175 = vtanh.f32 %v1976_v60  ;;  %v2590_v2 = vmul.f32 -1.442695, %v1976_v60 }
0x114e   :  { %3177 = vpow2.f32 %v2587_v1 }
0x114f   :  { %3179 = vpow2.f32 %v2590_v2 }
0x1154   :  { %v3174_v62 = vpop.eup %3173 }
0x1155   :  { %1816 = vrot.lane.b32.xlu0 %v3174_v62, %s3279_s8 }
0x115a   :  { %v3176_v63 = vpop.eup %3175 }
0x115b   :  { %1986 = vrot.lane.b32.xlu1 %v3176_v63, %s3279_s8  ;;  %v3178_v3 = vpop.eup %3177 }
0x115c   :  { %v1810_v5 = vadd.f32 1.0, %v3178_v3  ;;  %v3180_v25 = vpop.eup %3179 }
0x115d   :  { %v1980_v7 = vadd.f32 1.0, %v3180_v25  ;;  %v3226_v25 = vld [vmem:[#allocation2 + $0x38] sm:$0xff] }
0x115e   :  { %3181 = vrcp.f32 %v1810_v5  ;;  %v3225_v5 = vld [vmem:[#allocation2 + $0x40] sm:$0xff] }
0x115f   :  { %3183 = vrcp.f32 %v1980_v7  ;;  %v3227_v7 = vld [vmem:[#allocation2 + $0x30] sm:$0xff] }
0x116b   :  { %v3182_v4 = vpop.eup %3181 }
0x116c   :  { %v3184_v11 = vpop.eup %3183  ;;  %v1814_v6 = vmul.f32 %v3182_v4, %v3669_v38 }
0x116d   :  { %v1984_v19 = vmul.f32 %v3184_v11, %v3673_v41 }
0x11c7   :  { %v1817_v33 = vpop.permute.xlu0 %1816 }
0x11c8   :  { %v1819_v8 = vmul.f32 %v3182_v4, %v1817_v33  ;;  %v3228_v33 = vld [vmem:[#allocation2 + $0x28] sm:$0xff] }
0x11ca   :  { %1821 = vrot.lane.b32.xlu0 %v1819_v8, %s3280_s9 }
0x11cd   :  { %v1987_v12 = vpop.permute.xlu1 %1986 }
0x11ce   :  { %v1989_v13 = vmul.f32 %v3184_v11, %v1987_v12 }
0x11d0   :  { %1991 = vrot.lane.b32.xlu1 %v1989_v13, %s3280_s9 }
0x123c   :  { %v1822_v18 = vpop.permute.xlu0 %1821 }
0x123d   :  { %v3716_v9 = vadd.f32 %v1822_v18, %v1814_v6  ;;  %v3229_v18 = vld [vmem:[%s3807_s2 + $0x1] ss:$0 sm:$0xff] }
0x123f   :  { %3185 = vtanh.f32 %v3716_v9 }
0x1242   :  { %v1992_v10 = vpop.permute.xlu1 %1991 }
0x1243   :  { %v3720_v20 = vadd.f32 %v1992_v10, %v1984_v19 }
0x1245   :  { %3187 = vtanh.f32 %v3720_v20 }
0x124c   :  { %v3186_v21 = vpop.eup %3185 }
0x124d   :  { %1827 = vrot.lane.b32.xlu0 %v3186_v21, %s3279_s8 }
0x1252   :  { %v3188_v22 = vpop.eup %3187 }
0x1253   :  { %1997 = vrot.lane.b32.xlu1 %v3188_v22, %s3279_s8 }
0x12bf   :  { %v1828_v24 = vpop.permute.xlu0 %1827 }
0x12c0   :  { %v1830_v26 = vmul.f32 %v3182_v4, %v1828_v24 }
0x12c2   :  { %1832 = vrot.lane.b32.xlu0 %v1830_v26, %s3280_s9 }
0x12c5   :  { %v1998_v28 = vpop.permute.xlu1 %1997 }
0x12c6   :  { %v2000_v27 = vmul.f32 %v3184_v11, %v1998_v28 }
0x12c8   :  { %2002 = vrot.lane.b32.xlu1 %v2000_v27, %s3280_s9 }
0x1334   :  { %v1833_v30 = vpop.permute.xlu0 %1832 }
0x1335   :  { %2974 = vmatmul.mubr.msk.f32.vlgmr.msra.gmra.mxu0 %vm212_vm2, %v1833_v30 }
0x1336   :  { %2988 = vmatpush3.msra.mxu0 %v3413_v50  ;;  %2995 = vmatprep.mubr.msk.f32.mxu0 %vm3278_vm0, %v3277_v0  ;;  %v3221_v50 = vld [vmem:[#allocation2 + $0x20] sm:$0xff] }
0x1337   :  { %2989 = vmatprep.subr.mxu0 %v3277_v0 }
0x1338   :  { %2990 = vmatpush3.msra.mxu0 %v3415_v51  ;;  %v3222_v51 = vld [vmem:[#allocation2 + $0x18] sm:$0xff] }
0x1339   :  { %2991 = vmatprep.subr.mxu0 %v3277_v0 }
0x133a   :  { %2992 = vmatpush3.msra.mxu0 %v3419_v52  ;;  %v2003_v32 = vpop.permute.xlu1 %2002  ;;  %v3223_v52 = vld [vmem:[#allocation2 + $0x10] sm:$0xff] }
0x133b   :  { %2993 = vmatprep.subr.mxu0 %v3277_v0 }
0x133c   :  { %2994 = vmatpush3.msra.mxu0 %v3423_v53  ;;  %v3224_v53 = vld [vmem:[#allocation2 + $0x8] sm:$0xff] }
0x133d   :  { %2996 = vmatmul.mubr.msk.f32.vlgmr.msra.gmra.mxu0 %vm212_vm2, %v2003_v32  ;;  %3009 = vmatprep.subr.mxu0 %v3277_v0 }
0x133e   :  { %3010 = vmatpush3.msra.mxu0 %v3221_v50  ;;  %3017 = vmatprep.mubr.msk.f32.mxu0 %vm3278_vm0, %v3277_v0  ;;  %v44_v50 = vld [vmem:[#allocation2 + $0x78] sm:$0xff] }
0x133f   :  { %3011 = vmatprep.subr.mxu0 %v3277_v0 }
0x1340   :  { %3012 = vmatpush3.msra.mxu0 %v3222_v51  ;;  %v43_v51 = vld [vmem:[#allocation2 + $0x70] sm:$0xff] }
0x1341   :  { %3013 = vmatprep.subr.mxu0 %v3277_v0 }
0x1342   :  { %3014 = vmatpush3.msra.mxu0 %v3223_v52  ;;  %v42_v52 = vld [vmem:[#allocation2 + $0x68] sm:$0xff] }
0x1343   :  { %3015 = vmatprep.subr.mxu0 %v3277_v0 }
0x1344   :  { %3016 = vmatpush3.msra.mxu0 %v3224_v53 }
0x1345   :  { %3018 = vmatmul.mubr.msk.f32.vlgmr.msra.gmra.mxu0 %vm212_vm2, %v2003_v32  ;;  %3031 = vmatprep.subr.mxu0 %v3277_v0  ;;  %v45_v32 = vld [vmem:[#allocation2 + $0x80] sm:$0xff] }
0x1346   :  { %3039 = vmatprep.mubr.msk.f32.mxu0 %vm3278_vm0, %v3277_v0  ;;  %3032 = vmatpush3.msra.mxu0 %v45_v32 }
0x1347   :  { %3033 = vmatprep.subr.mxu0 %v3277_v0 }
0x1348   :  { %3034 = vmatpush3.msra.mxu0 %v44_v50 }
0x1349   :  { %3035 = vmatprep.subr.mxu0 %v3277_v0 }
0x134a   :  { %3036 = vmatpush3.msra.mxu0 %v43_v51 }
0x134b   :  { %3037 = vmatprep.subr.mxu0 %v3277_v0 }
0x134c   :  { %3038 = vmatpush3.msra.mxu0 %v42_v52 }
0x13f5   :  { %v1902_v34 = vpop.f32.mrf.mxu0 }
0x13f7   :  { %v2975_v35 = vpop.f32.mrf.mxu0 }
0x13f8   :  { %v60_v35 = vld [vmem:[#allocation2 + $0xf8] sm:$0xff] }
0x13fd   :  { %v2072_v36 = vpop.f32.mrf.mxu0 }
0x13fe   :  { %v2073_v37 = vadd.f32 %v2072_v36, %v1902_v34  ;;  %v61_v34 = vld [vmem:[#allocation2 + $0x100] sm:$0xff]  ;;  %v59_v36 = vld [vmem:[#allocation2 + $0xf0] sm:$0xff] }
0x13ff   :  { %v2997_v38 = vpop.f32.mrf.mxu0 }
0x1400   :  { %v2076_v39 = vadd.f32 %v3456_v58, %v2073_v37  ;;  %v58_v37 = vld [vmem:[#allocation2 + $0xe8] sm:$0xff]  ;;  %v57_v38 = vld [vmem:[#allocation2 + $0xe0] sm:$0xff] }
0x1402   :  { %3189 = vtanh.f32 %v2076_v39  ;;  %v2592_v45 = vmul.f32 -1.442695, %v2076_v39  ;;  %v56_v39 = vld [vmem:[#allocation2 + $0xd8] sm:$0xff] }
0x1405   :  { %v2242_v40 = vpop.f32.mrf.mxu0 }
0x1406   :  { %v2246_v41 = vadd.f32 %v2242_v40, %v3402_v31 }
0x1407   :  { %v3019_v42 = vpop.f32.mrf.mxu0 }
0x1408   :  { %3191 = vtanh.f32 %v2246_v41  ;;  %v2595_v29 = vmul.f32 -1.442695, %v2246_v41  ;;  %v55_v41 = vld [vmem:[#allocation2 + $0xd0] sm:$0xff] }
0x1409   :  { %3193 = vpow2.f32 %v2592_v45  ;;  %v52_v45 = vld [vmem:[#allocation2 + $0xb8] sm:$0xff] }
0x140a   :  { %3195 = vpow2.f32 %v2595_v29  ;;  %v51_v29 = vld [vmem:[#allocation2 + $0xb0] sm:$0xff] }
0x140f   :  { %v3190_v43 = vpop.eup %3189 }
0x1410   :  { %2086 = vrot.lane.b32.xlu0 %v3190_v43, %s3279_s8  ;;  %v54_v43 = vld [vmem:[#allocation2 + $0xc8] sm:$0xff] }
0x1415   :  { %v3192_v44 = vpop.eup %3191 }
0x1416   :  { %2256 = vrot.lane.b32.xlu1 %v3192_v44, %s3279_s8  ;;  %v3194_v46 = vpop.eup %3193  ;;  %v53_v44 = vld [vmem:[#allocation2 + $0xc0] sm:$0xff] }
0x1417   :  { %v2080_v47 = vadd.f32 1.0, %v3194_v46  ;;  %v3196_v48 = vpop.eup %3195  ;;  %v50_v46 = vld [vmem:[#allocation2 + $0xa8] sm:$0xff] }
0x1418   :  { %v2250_v58 = vadd.f32 1.0, %v3196_v48 }
0x1419   :  { %3197 = vrcp.f32 %v2080_v47  ;;  %v49_v47 = vld [vmem:[#allocation2 + $0xa0] sm:$0xff] }
0x141a   :  { %3199 = vrcp.f32 %v2250_v58  ;;  %v48_v58 = vld [vmem:[#allocation2 + $0x98] sm:$0xff] }
0x1426   :  { %v3198_v14 = vpop.eup %3197 }
0x1427   :  { %v3200_v16 = vpop.eup %3199  ;;  %v2084_v54 = vmul.f32 %v3198_v14, %v3716_v9 }
0x1428   :  { %v2254_v57 = vmul.f32 %v3200_v16, %v3720_v20 }
0x1482   :  { %v2087_v31 = vpop.permute.xlu0 %2086 }
0x1483   :  { %v2089_v15 = vmul.f32 %v3198_v14, %v2087_v31  ;;  %v46_v31 = vld [vmem:[#allocation2 + $0x88] sm:$0xff] }
0x1485   :  { %2091 = vrot.lane.b32.xlu0 %v2089_v15, %s3280_s9  ;;  %v2598_v15 = vld [vmem:[%s3807_s2 + $0x2] ss:$0 sm:$0xff] }
0x1488   :  { %v2257_v17 = vpop.permute.xlu1 %2256 }
0x1489   :  { %v2259_v49 = vmul.f32 %v3200_v16, %v2257_v17 }
0x148b   :  { %2261 = vrot.lane.b32.xlu1 %v2259_v49, %s3280_s9 }
0x14f7   :  { %v2092_v55 = vpop.permute.xlu0 %2091 }
0x14f8   :  { %v2094_v56 = vadd.f32 %v2092_v55, %v2084_v54 }
0x14fa   :  { %3201 = vtanh.f32 %v2094_v56 }
0x14fd   :  { %v2262_v59 = vpop.permute.xlu1 %2261 }
0x14fe   :  { %v2264_v23 = vadd.f32 %v2262_v59, %v2254_v57 }
0x1500   :  { %3203 = vtanh.f32 %v2264_v23 }
0x1507   :  { %v3202_v60 = vpop.eup %3201 }
0x1508   :  { %2097 = vrot.lane.b32.xlu0 %v3202_v60, %s3279_s8 }
0x150d   :  { %v3204_v61 = vpop.eup %3203 }
0x150e   :  { %2267 = vrot.lane.b32.xlu1 %v3204_v61, %s3279_s8 }
0x157a   :  { %v2098_v62 = vpop.permute.xlu0 %2097 }
0x157b   :  { %v2100_v63 = vmul.f32 %v3198_v14, %v2098_v62  ;;  %v47_v14 = vld [vmem:[#allocation2 + $0x90] sm:$0xff] }
0x157d   :  { %2102 = vrot.lane.b32.xlu0 %v2100_v63, %s3280_s9 }
0x1580   :  { %v2268_v1 = vpop.permute.xlu1 %2267 }
0x1581   :  { %v2270_v2 = vmul.f32 %v3200_v16, %v2268_v1 }
0x1583   :  { %2272 = vrot.lane.b32.xlu1 %v2270_v2, %s3280_s9 }
0x15ef   :  { %v2103_v3 = vpop.permute.xlu0 %2102 }
0x15f0   :  { %3007 = vmatmul.mubr.msk.f32.vlgmr.msra.gmra.mxu1 %vm212_vm2, %v2103_v3 }
0x15f1   :  { %3021 = vmatpush3.msra.mxu1 %v3225_v5  ;;  %3028 = vmatprep.mubr.msk.f32.mxu1 %vm3278_vm0, %v3277_v0 }
0x15f2   :  { %3022 = vmatprep.subr.mxu1 %v3277_v0 }
0x15f3   :  { %3023 = vmatpush3.msra.mxu1 %v3226_v25 }
0x15f4   :  { %3024 = vmatprep.subr.mxu1 %v3277_v0 }
0x15f5   :  { %3025 = vmatpush3.msra.mxu1 %v3227_v7  ;;  %v2273_v4 = vpop.permute.xlu1 %2272 }
0x15f6   :  { %3026 = vmatprep.subr.mxu1 %v3277_v0 }
0x15f7   :  { %3027 = vmatpush3.msra.mxu1 %v3228_v33 }
0x15f8   :  { %3029 = vmatmul.mubr.msk.f32.vlgmr.msra.gmra.mxu1 %vm212_vm2, %v2273_v4  ;;  %3042 = vmatprep.subr.mxu1 %v3277_v0 }
0x15f9   :  { %3074 = vmatprep.mubr.msk.f32.mxu1 %vm3278_vm0, %v3277_v0  ;;  %3043 = vmatpush3.msra.mxu1 %v61_v34 }
0x15fa   :  { %3044 = vmatprep.subr.mxu1 %v3277_v0 }
0x15fb   :  { %3045 = vmatpush3.msra.mxu1 %v60_v35 }
0x15fc   :  { %3046 = vmatprep.subr.mxu1 %v3277_v0 }
0x15fd   :  { %3047 = vmatpush3.msra.mxu1 %v59_v36 }
0x15fe   :  { %3048 = vmatprep.subr.mxu1 %v3277_v0 }
0x15ff   :  { %3049 = vmatpush3.msra.mxu1 %v58_v37 }
0x1600   :  { %3050 = vmatprep.subr.mxu1 %v3277_v0 }
0x1601   :  { %3051 = vmatpush3.msra.mxu1 %v57_v38 }
0x1602   :  { %3052 = vmatprep.subr.mxu1 %v3277_v0 }
0x1603   :  { %3053 = vmatpush3.msra.mxu1 %v56_v39 }
0x1604   :  { %3054 = vmatprep.subr.mxu1 %v3277_v0 }
0x1605   :  { %3055 = vmatpush3.msra.mxu1 %v55_v41 }
0x1606   :  { %3056 = vmatprep.subr.mxu1 %v3277_v0 }
0x1607   :  { %3057 = vmatpush3.msra.mxu1 %v54_v43 }
0x1608   :  { %3058 = vmatprep.subr.mxu1 %v3277_v0 }
0x1609   :  { %3059 = vmatpush3.msra.mxu1 %v53_v44 }
0x160a   :  { %3060 = vmatprep.subr.mxu1 %v3277_v0 }
0x160b   :  { %3061 = vmatpush3.msra.mxu1 %v52_v45 }
0x160c   :  { %3062 = vmatprep.subr.mxu1 %v3277_v0 }
0x160d   :  { %3063 = vmatpush3.msra.mxu1 %v51_v29 }
0x160e   :  { %3064 = vmatprep.subr.mxu1 %v3277_v0 }
0x160f   :  { %3065 = vmatpush3.msra.mxu1 %v50_v46 }
0x1610   :  { %3066 = vmatprep.subr.mxu1 %v3277_v0 }
0x1611   :  { %3067 = vmatpush3.msra.mxu1 %v49_v47 }
0x1612   :  { %3068 = vmatprep.subr.mxu1 %v3277_v0 }
0x1613   :  { %3069 = vmatpush3.msra.mxu1 %v48_v58 }
0x1614   :  { %3070 = vmatprep.subr.mxu1 %v3277_v0 }
0x1615   :  { %3071 = vmatpush3.msra.mxu1 %v47_v14 }
0x1616   :  { %3072 = vmatprep.subr.mxu1 %v3277_v0 }
0x1617   :  { %3073 = vmatpush3.msra.mxu1 %v46_v31 }
0x16b0   :  { %v2172_v8 = vpop.f32.mrf.mxu1 }
0x16b2   :  { %v3008_v11 = vpop.f32.mrf.mxu1 }
0x16b8   :  { %v2342_v12 = vpop.f32.mrf.mxu1 }
0x16b9   :  { %v2343_v13 = vadd.f32 %v2342_v12, %v2172_v8 }
0x16ba   :  { %v3030_v6 = vpop.f32.mrf.mxu1 }
0x16bb   :  { %v2346_v9 = vadd.f32 %v3229_v18, %v2343_v13 }
0x16bd   :  { %3205 = vtanh.f32 %v2346_v9  ;;  %v2597_v10 = vmul.f32 -1.442695, %v2346_v9 }
0x16bf   :  { %3207 = vpow2.f32 %v2597_v10 }
0x16ca   :  { %v3206_v19 = vpop.eup %3205 }
0x16cb   :  { %2356 = vrot.lane.b32.xlu0 %v3206_v19, %s3279_s8 }
0x16cc   :  { %v3208_v20 = vpop.eup %3207 }
0x16cd   :  { %v2350_v21 = vadd.f32 1.0, %v3208_v20 }
0x16cf   :  { %3209 = vrcp.f32 %v2350_v21 }
0x16dc   :  { %v3210_v22 = vpop.eup %3209 }
0x16dd   :  { %v2354_v28 = vmul.f32 %v3210_v22, %v2094_v56  ;;  %v2600_v56 = vld [vmem:[%s3807_s2 + $0x3] ss:$0 sm:$0xff] }
0x173d   :  { %v2357_v24 = vpop.permute.xlu0 %2356 }
0x173e   :  { %v2359_v26 = vmul.f32 %v3210_v22, %v2357_v24 }
0x1740   :  { %2361 = vrot.lane.b32.xlu1 %v2359_v26, %s3280_s9 }
0x17b2   :  { %v2362_v27 = vpop.permute.xlu1 %2361 }
0x17b3   :  { %v2364_v30 = vadd.f32 %v2362_v27, %v2354_v28 }
0x17b5   :  { %3211 = vtanh.f32 %v2364_v30 }
0x17c2   :  { %v3212_v53 = vpop.eup %3211 }
0x17c3   :  { %2367 = vrot.lane.b32.xlu0 %v3212_v53, %s3279_s8 }
0x1835   :  { %v2368_v40 = vpop.permute.xlu0 %2367 }
0x1836   :  { %v2370_v42 = vmul.f32 %v3210_v22, %v2368_v40 }
0x1838   :  { %2376 = vrot.lane.b32.xlu1 %v2370_v42, %s3280_s9 }
0x18aa   :  { %v2377_v48 = vpop.permute.xlu1 %2376 }
0x18ab   :  { %3040 = vmatmul.mubr.msk.f32.vlgmr.msra.gmra.mxu0 %vm212_vm2, %v2377_v48 }
0x196b   :  { %v2446_v16 = vpop.f32.mrf.mxu0 }
0x196c   :  { %v2447_v17 = vadd.f32 %v2598_v15, %v2446_v16 }
0x196d   :  { %v3041_v49 = vpop.f32.mrf.mxu0 }
0x196e   :  { %vm2450_vm3 = vcmp.ge.f32.partialorder %v2447_v17, 0.0  ;;  %v2451_v54 = vmul.f32 0.05, %v2447_v17 }
0x1970   :  { %v2452_v55 = vsel %vm2450_vm3, %v2447_v17, %v2451_v54 }
0x1971   :  { %3075 = vmatmul.mubr.f32.vlgmr.msra.gmra.mxu1 %v2452_v55 }
0x1a31   :  { %v2523_v57 = vpop.f32.mrf.mxu1 }
0x1a32   :  { %v2524_v59 = vadd.f32 %v2600_v56, %v2523_v57 }
0x1a33   :  { %v3076_v23 = vpop.f32.mrf.mxu1 }
0x1a34   :  { %v2601_v0 = vmul.f32 -1.442695, %v2524_v59 }
0x1a36   :  { %3213 = vpow2.f32 %v2601_v0 }
0x1a43   :  { %v3214_v60 = vpop.eup %3213 }
0x1a44   :  { %v2530_v61 = vadd.f32 1.0, %v3214_v60 }
0x1a46   :  { %3215 = vrcp.f32 %v2530_v61 }
0x1a53   :  { %v3216_v62 = vpop.eup %3215 }
0x1a54   :  { %2534 = vst.msk [vmem:[#allocation5] sm:$0x3] %vm2533_vm4, %v3216_v62 }
0x1a55   :  { %3261 = shalt.err (!%p3258_p9)
}
0x1a56   :  { %2544 = dma.vmem_to_hbm [thread:$0]  %s2542_s19, 32, %s3808_s3, [#allocation4]  }
0x1a57   :  { %3272 = dma.done.wait [#allocation4], 32  }
0x1a58   :  { %3273 = vsyncadd [#allocation4], 4294967264 }
0x1a59   :  { %2548 = vsyncpa [#allocation3], 1 }
0x1a5a   :  { %2549 = vsyncpa [#allocation4], 1 }

</bundles_post_ra>
